<compile_context>
chip_gen: v5e
topology: v5e:2x2
jax: 0.10.0
libtpu: 0.0.40
codegen_flags: <defaults>
</compile_context>

<pallas_src>
import math
import functools

import jax
import jax.numpy as jnp
from jax import lax
from jax.experimental import pallas as pl
from jax.experimental.pallas import tpu as pltpu


# ---------------------------------------------------------------------------
# In-kernel helper: head-batched MHA + output projection + residual
# ---------------------------------------------------------------------------

def _mha_heads(src_q_b, src_kv_b, bias2d,
               wq, bq, wk, bk, wv, bv, wo, bo, res2d):
    """src_q_b: (H, Lq, D) bf16, src_kv_b: (H, Lk, D) bf16,
    bias2d: (Lq, Lk) bf16 additive mask bias or None,
    wq/wk/wv: (H, D, dh) bf16 (wq pre-scaled by 1/sqrt(dh)), bq/bk/bv: (H, 1, dh) f32,
    wo: (H, dh, D) bf16, bo: (1, D) f32, res2d: (Lq, D) f32.  Returns (Lq, D) f32."""
    f32 = jnp.float32
    q3 = (jnp.einsum('hqc,hcd->hqd', src_q_b, wq, preferred_element_type=f32)
          + bq).astype(jnp.bfloat16)
    k3 = (jnp.einsum('hkc,hcd->hkd', src_kv_b, wk, preferred_element_type=f32)
          + bk).astype(jnp.bfloat16)
    v3 = (jnp.einsum('hkc,hcd->hkd', src_kv_b, wv, preferred_element_type=f32)
          + bv).astype(jnp.bfloat16)

    # scores for all heads in one batched dot (contract last dims -> no k.T)
    s = jnp.einsum('hqd,hkd->hqk', q3, k3, preferred_element_type=f32)
    if bias2d is not None:
        s = s + bias2d.astype(f32)[None]          # additive mask bias (one VPU add)
    s = s - jnp.max(s, axis=-1, keepdims=True)
    p = jnp.exp(s)
    p = p * pl.reciprocal(jnp.sum(p, axis=-1, keepdims=True), approx=True)

    ctx = jnp.einsum('hqk,hkd->hqd', p.astype(jnp.bfloat16), v3,
                     preferred_element_type=f32)
    # output projection: contract dh per head, then reduce over heads
    o3 = jnp.einsum('hqd,hdc->hqc', ctx.astype(jnp.bfloat16), wo,
                    preferred_element_type=f32)
    return jnp.sum(o3, axis=0) + bo + res2d


# ---------------------------------------------------------------------------
# Fused layer kernel: grid = (batch, query_tile)
# ---------------------------------------------------------------------------

def _attention_layer_kernel(*refs, n_head, q_tile, has_am, has_rm):
    it = iter(refs)
    hs_ref = next(it)                    # (1, L, D)  f32
    jr_ref = next(it)                    # (1, Lj, D) f32
    am_ref = next(it) if has_am else None    # (1, tq, L)  bf16 additive bias
    rm_ref = next(it) if has_rm else None    # (1, tq, Lj) bf16 additive bias
    np_ref = next(it)                    # (1, L, 1)  f32
    (wq_i, bq_i, wk_i, bk_i, wv_i, bv_i, wo_i, bo_i,
     wq_x, bq_x, wk_x, bk_x, wv_x, bv_x, wo_x, bo_x,
     w1, b1, w2, b2) = [next(it)[...] for _ in range(20)]
    out_ref = next(it)                   # (1, tq, D) f32
    emb_ref = next(it)                   # (1, 1, D)  f32 (accumulated over tiles)

    H = n_head
    L = hs_ref.shape[1]
    qi = pl.program_id(1)

    x_full = hs_ref[0]                   # (L, D) f32
    npm = np_ref[0]                      # (L, 1) f32
    if q_tile == L:                      # single query tile: no slicing needed
        x_tile = x_full
        npm_t = npm
    else:
        row0 = pl.multiple_of(qi * q_tile, q_tile)
        x_tile = lax.dynamic_slice_in_dim(x_full, row0, q_tile, 0)
        npm_t = lax.dynamic_slice_in_dim(npm, row0, q_tile, 0)

    x_full_b = jnp.broadcast_to(x_full.astype(jnp.bfloat16)[None],
                                (H,) + x_full.shape)
    x_tile_b = jnp.broadcast_to(x_tile.astype(jnp.bfloat16)[None],
                                (H,) + x_tile.shape)
    jr = jr_ref[0]
    jr_b = jnp.broadcast_to(jr.astype(jnp.bfloat16)[None], (H,) + jr.shape)

    am_bias = am_ref[0] if has_am else None
    rm_bias = rm_ref[0] if has_rm else None

    # ---- intra (self) attention, residual = hidden_states ----------------
    intra = _mha_heads(x_tile_b, x_full_b, am_bias,
                       wq_i, bq_i, wk_i, bk_i, wv_i, bv_i, wo_i, bo_i, x_tile)
    intra = intra * npm_t

    # ---- inter (cross) attention: q from masked intra, k/v from joint_rep
    intra_b = jnp.broadcast_to(intra.astype(jnp.bfloat16)[None],
                               (H,) + intra.shape)
    inter = _mha_heads(intra_b, jr_b, rm_bias,
                       wq_x, bq_x, wk_x, bk_x, wv_x, bv_x, wo_x, bo_x, intra)
    inter = inter * npm_t

    # ---- FFN: linear -> relu -> linear (+ masked intra residual) ---------
    h = jnp.maximum(jnp.dot(inter.astype(jnp.bfloat16), w1,
                            preferred_element_type=jnp.float32) + b1, 0.0)
    y = jnp.dot(h.astype(jnp.bfloat16), w2,
                preferred_element_type=jnp.float32) + b2 + intra
    y = y * npm_t

    out_ref[0] = y

    # ---- pooled embedding accumulated across query tiles ------------------
    @pl.when(qi == 0)
    def _init():
        emb_ref[...] = jnp.zeros_like(emb_ref)
    emb_ref[0] += jnp.sum(y, axis=0, keepdims=True)

    @pl.when(qi == pl.num_programs(1) - 1)
    def _finalize():
        # matches PyTorch: layer_output.sum(1) / non_pad_mask.sum(1) (no 0 guard)
        emb_ref[0] = emb_ref[0] / jnp.sum(npm, axis=0, keepdims=True)


# ---------------------------------------------------------------------------
# Wrapper
# ---------------------------------------------------------------------------

def attention_layer_forward(params, hidden_states, non_pad_mask,
                            attention_mask, joint_rep, rep_tag_mask):
    B, L, D = hidden_states.shape
    Lj = joint_rep.shape[1]
    H = params["n_head"]

    hidden_states = hidden_states.astype(jnp.float32)
    joint_rep = joint_rep.astype(jnp.float32)
    if non_pad_mask is None:
        non_pad_mask = jnp.ones((B, L, 1), jnp.float32)
    else:
        non_pad_mask = non_pad_mask.astype(jnp.float32)

    has_am = attention_mask is not None
    has_rm = rep_tag_mask is not None
    mask_args = []
    if has_am:   # compact bf16 additive bias: True/1 -> -1e7, False/0 -> 0
        mask_args.append(
            (attention_mask.astype(jnp.float32) * (-1e7)).astype(jnp.bfloat16))
    if has_rm:
        mask_args.append(
            (rep_tag_mask.astype(jnp.float32) * (-1e7)).astype(jnp.bfloat16))

    # Query-tile the sequence so the per-step VMEM footprint stays bounded.
    q_tile = 128 if (L > 128 and L % 128 == 0) else L
    n_q_tiles = L // q_tile

    p_i, p_x, p_f = params["intra"], params["inter"], params["ffn"]
    weights = ([p_i[k] for k in ("wq", "bq", "wk", "bk", "wv", "bv", "wo", "bo")]
               + [p_x[k] for k in ("wq", "bq", "wk", "bk", "wv", "bv", "wo", "bo")]
               + [p_f[k] for k in ("w1", "b1", "w2", "b2")])

    batch_full = lambda b, t: (b, 0, 0)
    tile_row = lambda b, t: (b, t, 0)

    in_specs = [pl.BlockSpec((1, L, D), batch_full),     # hidden_states
                pl.BlockSpec((1, Lj, D), batch_full)]    # joint_rep
    if has_am:
        in_specs.append(pl.BlockSpec((1, q_tile, L), tile_row))
    if has_rm:
        in_specs.append(pl.BlockSpec((1, q_tile, Lj), tile_row))
    in_specs.append(pl.BlockSpec((1, L, 1), batch_full))  # non_pad_mask
    # TODO(synk): pipeline_mode=pl.Buffered(1) on these constant-index weight
    #             blocks would halve their double-buffered VMEM.
    in_specs += [pl.BlockSpec(w.shape, (lambda b, t, n=w.ndim: (0,) * n))
                 for w in weights]

    out_shape = (jax.ShapeDtypeStruct((B, L, D), jnp.float32),
                 jax.ShapeDtypeStruct((B, 1, D), jnp.float32))
    out_specs = (pl.BlockSpec((1, q_tile, D), tile_row),
                 pl.BlockSpec((1, 1, D), batch_full))

    kernel = functools.partial(_attention_layer_kernel, n_head=H,
                               q_tile=q_tile, has_am=has_am, has_rm=has_rm)

    layer_output, embs = pl.pallas_call(
        kernel,
        grid=(B, n_q_tiles),
        in_specs=in_specs,
        out_specs=out_specs,
        out_shape=out_shape,
        compiler_params=pltpu.CompilerParams(
            dimension_semantics=("parallel", "arbitrary"),
            vmem_limit_bytes=48 * 1024 * 1024),
    )(hidden_states, joint_rep, *mask_args, non_pad_mask, *weights)

    all_attentions = ()   # output_attentions=False path of the reference module
    return layer_output, embs.reshape(B, D), all_attentions


# ---------------------------------------------------------------------------
# Parameter init (mimics nn.Linear default uniform init).
# Weights are stored head-major and bf16; the 1/sqrt(head_dim) softmax scale is
# folded into the q projection weights/bias.  Biases stay f32.
# ---------------------------------------------------------------------------

def _init_linear(key, din, dout):
    k1, k2 = jax.random.split(key)
    bound = 1.0 / math.sqrt(din)
    w = jax.random.uniform(k1, (din, dout), jnp.float32, -bound, bound)
    b = jax.random.uniform(k2, (1, dout), jnp.float32, -bound, bound)
    return w, b


def init_params(key, model_dim, vision_dim, n_head):
    head_dim = model_dim // n_head
    scale = 1.0 / math.sqrt(head_dim)
    keys = jax.random.split(key, 10)

    def head_major(w, b):
        # (D, H*dh) -> (H, D, dh);  (1, H*dh) -> (H, 1, dh)
        w3 = w.reshape(model_dim, n_head, head_dim).transpose(1, 0, 2)
        b3 = b.reshape(1, n_head, head_dim).transpose(1, 0, 2)
        return w3, b3

    def attn_params(kq, kk, kv, ko):
        wq, bq = _init_linear(kq, model_dim, model_dim)
        wk, bk = _init_linear(kk, model_dim, model_dim)
        wv, bv = _init_linear(kv, model_dim, model_dim)
        wo, bo = _init_linear(ko, model_dim, model_dim)
        wq3, bq3 = head_major(wq * scale, bq * scale)   # fold softmax scale (free)
        wk3, bk3 = head_major(wk, bk)
        wv3, bv3 = head_major(wv, bv)
        wo3 = wo.reshape(n_head, head_dim, model_dim)   # (H*dh, D) -> (H, dh, D)
        return dict(wq=wq3.astype(jnp.bfloat16), bq=bq3,
                    wk=wk3.astype(jnp.bfloat16), bk=bk3,
                    wv=wv3.astype(jnp.bfloat16), bv=bv3,
                    wo=wo3.astype(jnp.bfloat16), bo=bo)

    intra = attn_params(keys[0], keys[1], keys[2], keys[3])
    inter = attn_params(keys[4], keys[5], keys[6], keys[7])
    w1, b1 = _init_linear(keys[8], model_dim, vision_dim)
    w2, b2 = _init_linear(keys[9], vision_dim, model_dim)
    ffn = dict(w1=w1.astype(jnp.bfloat16), b1=b1,
               w2=w2.astype(jnp.bfloat16), b2=b2)
    return dict(n_head=n_head, intra=intra, inter=inter, ffn=ffn)


# ---------------------------------------------------------------------------
# Pure-JAX (f32, XLA) reference replicating the PyTorch forward, for a loose
# tolerance check against the bf16 kernel.
# ---------------------------------------------------------------------------

def _reference_forward(params, hs, npm, am, jr, rm):
    f32 = jnp.float32

    def mha(p, q_in, kv_in, mask, residual):
        wq, wk, wv = (p["wq"].astype(f32), p["wk"].astype(f32), p["wv"].astype(f32))
        wo, bo = p["wo"].astype(f32), p["bo"]
        q = jnp.einsum('blc,hcd->bhld', q_in, wq) + p["bq"][None]
        k = jnp.einsum('blc,hcd->bhld', kv_in, wk) + p["bk"][None]
        v = jnp.einsum('blc,hcd->bhld', kv_in, wv) + p["bv"][None]
        s = jnp.einsum('bhqd,bhkd->bhqk', q, k)      # 1/sqrt(dh) folded into wq/bq
        if mask is not None:
            s = jnp.where(mask[:, None].astype(bool), f32(-1e7), s)
        pattn = jax.nn.softmax(s, axis=-1)
        ctx = jnp.einsum('bhqk,bhkd->bhqd', pattn, v)
        return jnp.einsum('bhqd,hdc->bqc', ctx, wo) + bo[None] + residual

    hs = hs.astype(f32)
    jr = jr.astype(f32)
    intra = mha(params["intra"], hs, hs, am, hs) * npm
    inter = mha(params["inter"], intra, jr, rm, intra) * npm
    w1, b1 = params["ffn"]["w1"].astype(f32), params["ffn"]["b1"]
    w2, b2 = params["ffn"]["w2"].astype(f32), params["ffn"]["b2"]
    h = jax.nn.relu(jnp.einsum('blc,cv->blv', inter, w1) + b1[None])
    y = (jnp.einsum('blv,vc->blc', h, w2) + b2[None] + intra) * npm
    embs = y.sum(axis=1) / npm.sum(axis=1)
    return y, embs


# ---------------------------------------------------------------------------

if __name__ == "__main__":
    B, L, Lj = 2, 8, 8          # batch, seq len, joint-rep len
    D, H, V = 128, 4, 256       # model_dim (128-lane aligned), heads, vision_dim

    root = jax.random.PRNGKey(0)
    k_in, k_joint, k_par = jax.random.split(root, 3)

    hidden_states = jax.random.normal(k_in, (B, L, D), jnp.float32)
    joint_rep = jax.random.normal(k_joint, (B, Lj, D), jnp.float32)

    # non_pad_mask: (B, L, 1), 1.0 = real token, 0.0 = pad
    non_pad_mask = jnp.ones((B, L, 1), jnp.float32).at[1, L - 2:, :].set(0.0)
    # attention_mask: (B, L, L) bool, True = masked
    attention_mask = jnp.zeros((B, L, L), bool).at[1, :, L - 2:].set(True)
    # rep_tag_mask: (B, L, Lj) bool, True = masked
    rep_tag_mask = jnp.zeros((B, L, Lj), bool).at[0, :, Lj - 1:].set(True)

    params = init_params(k_par, D, V, H)

    layer_output, embs, all_attentions = attention_layer_forward(
        params, hidden_states, non_pad_mask, attention_mask, joint_rep,
        rep_tag_mask)
    jax.block_until_ready((layer_output, embs))

    assert layer_output.shape == (B, L, D)
    assert embs.shape == (B, D)
    assert all_attentions == ()
    assert jnp.all(jnp.isfinite(layer_output)) and jnp.all(jnp.isfinite(embs))

    # Loose tolerance vs. an f32 XLA reference (kernel uses bf16 matmuls and an
    # approximate softmax reciprocal, so only ~2-3 decimal digits are expected).
    ref_out, ref_embs = _reference_forward(params, hidden_states, non_pad_mask,
                                           attention_mask, joint_rep,
                                           rep_tag_mask)
    err_out = float(jnp.max(jnp.abs(layer_output - ref_out)))
    err_emb = float(jnp.max(jnp.abs(embs - ref_embs)))
    assert err_out < 0.2 and err_emb < 0.2, (err_out, err_emb)

    print("KERNEL_OK")
</pallas_src>

<mosaic_0001>
module attributes {stable_mosaic.version = 11 : i64} {
  func.func @_attention_layer_kernel(%arg0: i32, %arg1: i32, %arg2: memref<1x8x128xf32, #tpu.memory_space<vmem>>, %arg3: memref<1x8x128xf32, #tpu.memory_space<vmem>>, %arg4: memref<1x8x8xbf16, #tpu.memory_space<vmem>>, %arg5: memref<1x8x8xbf16, #tpu.memory_space<vmem>>, %arg6: memref<1x8x1xf32, #tpu.memory_space<vmem>>, %arg7: memref<4x128x32xbf16, #tpu.memory_space<vmem>>, %arg8: memref<4x1x32xf32, #tpu.memory_space<vmem>>, %arg9: memref<4x128x32xbf16, #tpu.memory_space<vmem>>, %arg10: memref<4x1x32xf32, #tpu.memory_space<vmem>>, %arg11: memref<4x128x32xbf16, #tpu.memory_space<vmem>>, %arg12: memref<4x1x32xf32, #tpu.memory_space<vmem>>, %arg13: memref<4x32x128xbf16, #tpu.memory_space<vmem>>, %arg14: memref<1x128xf32, #tpu.memory_space<vmem>>, %arg15: memref<4x128x32xbf16, #tpu.memory_space<vmem>>, %arg16: memref<4x1x32xf32, #tpu.memory_space<vmem>>, %arg17: memref<4x128x32xbf16, #tpu.memory_space<vmem>>, %arg18: memref<4x1x32xf32, #tpu.memory_space<vmem>>, %arg19: memref<4x128x32xbf16, #tpu.memory_space<vmem>>, %arg20: memref<4x1x32xf32, #tpu.memory_space<vmem>>, %arg21: memref<4x32x128xbf16, #tpu.memory_space<vmem>>, %arg22: memref<1x128xf32, #tpu.memory_space<vmem>>, %arg23: memref<128x256xbf16, #tpu.memory_space<vmem>>, %arg24: memref<1x256xf32, #tpu.memory_space<vmem>>, %arg25: memref<256x128xbf16, #tpu.memory_space<vmem>>, %arg26: memref<1x128xf32, #tpu.memory_space<vmem>>, %arg27: memref<1x8x128xf32, #tpu.memory_space<vmem>>, %arg28: memref<1x1x128xf32, #tpu.memory_space<vmem>>) attributes {dimension_semantics = [#tpu.dimension_semantics<parallel>, #tpu.dimension_semantics<arbitrary>], iteration_bounds = array<i64: 2, 1>, scalar_prefetch = 0 : i64, scratch_operands = 0 : i64, tpu.core_type = #tpu.core_type<tc>, window_params = [{transform_indices = @transform_0, window_bounds = array<i64: 1, 8, 128>}, {transform_indices = @transform_1, window_bounds = array<i64: 1, 8, 128>}, {transform_indices = @transform_2, window_bounds = array<i64: 1, 8, 8>}, {transform_indices = @transform_3, window_bounds = array<i64: 1, 8, 8>}, {transform_indices = @transform_4, window_bounds = array<i64: 1, 8, 1>}, {pipeline_mode = #tpu.pipeline_mode<synchronous>, transform_indices = @transform_5, window_bounds = array<i64: 4, 128, 32>}, {pipeline_mode = #tpu.pipeline_mode<synchronous>, transform_indices = @transform_6, window_bounds = array<i64: 4, 1, 32>}, {pipeline_mode = #tpu.pipeline_mode<synchronous>, transform_indices = @transform_7, window_bounds = array<i64: 4, 128, 32>}, {pipeline_mode = #tpu.pipeline_mode<synchronous>, transform_indices = @transform_8, window_bounds = array<i64: 4, 1, 32>}, {pipeline_mode = #tpu.pipeline_mode<synchronous>, transform_indices = @transform_9, window_bounds = array<i64: 4, 128, 32>}, {pipeline_mode = #tpu.pipeline_mode<synchronous>, transform_indices = @transform_10, window_bounds = array<i64: 4, 1, 32>}, {pipeline_mode = #tpu.pipeline_mode<synchronous>, transform_indices = @transform_11, window_bounds = array<i64: 4, 32, 128>}, {pipeline_mode = #tpu.pipeline_mode<synchronous>, transform_indices = @transform_12, window_bounds = array<i64: 1, 128>}, {pipeline_mode = #tpu.pipeline_mode<synchronous>, transform_indices = @transform_13, window_bounds = array<i64: 4, 128, 32>}, {pipeline_mode = #tpu.pipeline_mode<synchronous>, transform_indices = @transform_14, window_bounds = array<i64: 4, 1, 32>}, {pipeline_mode = #tpu.pipeline_mode<synchronous>, transform_indices = @transform_15, window_bounds = array<i64: 4, 128, 32>}, {pipeline_mode = #tpu.pipeline_mode<synchronous>, transform_indices = @transform_16, window_bounds = array<i64: 4, 1, 32>}, {pipeline_mode = #tpu.pipeline_mode<synchronous>, transform_indices = @transform_17, window_bounds = array<i64: 4, 128, 32>}, {pipeline_mode = #tpu.pipeline_mode<synchronous>, transform_indices = @transform_18, window_bounds = array<i64: 4, 1, 32>}, {pipeline_mode = #tpu.pipeline_mode<synchronous>, transform_indices = @transform_19, window_bounds = array<i64: 4, 32, 128>}, {pipeline_mode = #tpu.pipeline_mode<synchronous>, transform_indices = @transform_20, window_bounds = array<i64: 1, 128>}, {pipeline_mode = #tpu.pipeline_mode<synchronous>, transform_indices = @transform_21, window_bounds = array<i64: 128, 256>}, {pipeline_mode = #tpu.pipeline_mode<synchronous>, transform_indices = @transform_22, window_bounds = array<i64: 1, 256>}, {pipeline_mode = #tpu.pipeline_mode<synchronous>, transform_indices = @transform_23, window_bounds = array<i64: 256, 128>}, {pipeline_mode = #tpu.pipeline_mode<synchronous>, transform_indices = @transform_24, window_bounds = array<i64: 1, 128>}, {transform_indices = @transform_25, window_bounds = array<i64: 1, 8, 128>}, {transform_indices = @transform_26, window_bounds = array<i64: 1, 1, 128>}]} {
    %c0 = arith.constant 0 : index
    %c0_0 = arith.constant 0 : index
    %c0_1 = arith.constant 0 : index
    %0 = vector.load %arg7[%c0, %c0_0, %c0_1] : memref<4x128x32xbf16, #tpu.memory_space<vmem>>, vector<4x128x32xbf16>
    %c0_2 = arith.constant 0 : index
    %c0_3 = arith.constant 0 : index
    %c0_4 = arith.constant 0 : index
    %1 = vector.load %arg8[%c0_2, %c0_3, %c0_4] : memref<4x1x32xf32, #tpu.memory_space<vmem>>, vector<4x1x32xf32>
    %c0_5 = arith.constant 0 : index
    %c0_6 = arith.constant 0 : index
    %c0_7 = arith.constant 0 : index
    %2 = vector.load %arg9[%c0_5, %c0_6, %c0_7] : memref<4x128x32xbf16, #tpu.memory_space<vmem>>, vector<4x128x32xbf16>
    %c0_8 = arith.constant 0 : index
    %c0_9 = arith.constant 0 : index
    %c0_10 = arith.constant 0 : index
    %3 = vector.load %arg10[%c0_8, %c0_9, %c0_10] : memref<4x1x32xf32, #tpu.memory_space<vmem>>, vector<4x1x32xf32>
    %c0_11 = arith.constant 0 : index
    %c0_12 = arith.constant 0 : index
    %c0_13 = arith.constant 0 : index
    %4 = vector.load %arg11[%c0_11, %c0_12, %c0_13] : memref<4x128x32xbf16, #tpu.memory_space<vmem>>, vector<4x128x32xbf16>
    %c0_14 = arith.constant 0 : index
    %c0_15 = arith.constant 0 : index
    %c0_16 = arith.constant 0 : index
    %5 = vector.load %arg12[%c0_14, %c0_15, %c0_16] : memref<4x1x32xf32, #tpu.memory_space<vmem>>, vector<4x1x32xf32>
    %c0_17 = arith.constant 0 : index
    %c0_18 = arith.constant 0 : index
    %c0_19 = arith.constant 0 : index
    %6 = vector.load %arg13[%c0_17, %c0_18, %c0_19] : memref<4x32x128xbf16, #tpu.memory_space<vmem>>, vector<4x32x128xbf16>
    %c0_20 = arith.constant 0 : index
    %c0_21 = arith.constant 0 : index
    %7 = vector.load %arg14[%c0_20, %c0_21] : memref<1x128xf32, #tpu.memory_space<vmem>>, vector<1x128xf32>
    %c0_22 = arith.constant 0 : index
    %c0_23 = arith.constant 0 : index
    %c0_24 = arith.constant 0 : index
    %8 = vector.load %arg15[%c0_22, %c0_23, %c0_24] : memref<4x128x32xbf16, #tpu.memory_space<vmem>>, vector<4x128x32xbf16>
    %c0_25 = arith.constant 0 : index
    %c0_26 = arith.constant 0 : index
    %c0_27 = arith.constant 0 : index
    %9 = vector.load %arg16[%c0_25, %c0_26, %c0_27] : memref<4x1x32xf32, #tpu.memory_space<vmem>>, vector<4x1x32xf32>
    %c0_28 = arith.constant 0 : index
    %c0_29 = arith.constant 0 : index
    %c0_30 = arith.constant 0 : index
    %10 = vector.load %arg17[%c0_28, %c0_29, %c0_30] : memref<4x128x32xbf16, #tpu.memory_space<vmem>>, vector<4x128x32xbf16>
    %c0_31 = arith.constant 0 : index
    %c0_32 = arith.constant 0 : index
    %c0_33 = arith.constant 0 : index
    %11 = vector.load %arg18[%c0_31, %c0_32, %c0_33] : memref<4x1x32xf32, #tpu.memory_space<vmem>>, vector<4x1x32xf32>
    %c0_34 = arith.constant 0 : index
    %c0_35 = arith.constant 0 : index
    %c0_36 = arith.constant 0 : index
    %12 = vector.load %arg19[%c0_34, %c0_35, %c0_36] : memref<4x128x32xbf16, #tpu.memory_space<vmem>>, vector<4x128x32xbf16>
    %c0_37 = arith.constant 0 : index
    %c0_38 = arith.constant 0 : index
    %c0_39 = arith.constant 0 : index
    %13 = vector.load %arg20[%c0_37, %c0_38, %c0_39] : memref<4x1x32xf32, #tpu.memory_space<vmem>>, vector<4x1x32xf32>
    %c0_40 = arith.constant 0 : index
    %c0_41 = arith.constant 0 : index
    %c0_42 = arith.constant 0 : index
    %14 = vector.load %arg21[%c0_40, %c0_41, %c0_42] : memref<4x32x128xbf16, #tpu.memory_space<vmem>>, vector<4x32x128xbf16>
    %c0_43 = arith.constant 0 : index
    %c0_44 = arith.constant 0 : index
    %15 = vector.load %arg22[%c0_43, %c0_44] : memref<1x128xf32, #tpu.memory_space<vmem>>, vector<1x128xf32>
    %c0_45 = arith.constant 0 : index
    %c0_46 = arith.constant 0 : index
    %16 = vector.load %arg23[%c0_45, %c0_46] : memref<128x256xbf16, #tpu.memory_space<vmem>>, vector<128x256xbf16>
    %c0_47 = arith.constant 0 : index
    %c0_48 = arith.constant 0 : index
    %17 = vector.load %arg24[%c0_47, %c0_48] : memref<1x256xf32, #tpu.memory_space<vmem>>, vector<1x256xf32>
    %c0_49 = arith.constant 0 : index
    %c0_50 = arith.constant 0 : index
    %18 = vector.load %arg25[%c0_49, %c0_50] : memref<256x128xbf16, #tpu.memory_space<vmem>>, vector<256x128xbf16>
    %c0_51 = arith.constant 0 : index
    %c0_52 = arith.constant 0 : index
    %19 = vector.load %arg26[%c0_51, %c0_52] : memref<1x128xf32, #tpu.memory_space<vmem>>, vector<1x128xf32>
    %c0_53 = arith.constant 0 : index
    %c0_54 = arith.constant 0 : index
    %c0_55 = arith.constant 0 : index
    %20 = vector.load %arg2[%c0_53, %c0_54, %c0_55] : memref<1x8x128xf32, #tpu.memory_space<vmem>>, vector<1x8x128xf32>
    %21 = vector.shape_cast %20 : vector<1x8x128xf32> to vector<8x128xf32>
    %c0_56 = arith.constant 0 : index
    %c0_57 = arith.constant 0 : index
    %c0_58 = arith.constant 0 : index
    %22 = vector.load %arg6[%c0_56, %c0_57, %c0_58] : memref<1x8x1xf32, #tpu.memory_space<vmem>>, vector<1x8x1xf32>
    %23 = vector.shape_cast %22 : vector<1x8x1xf32> to vector<8x1xf32>
    %24 = arith.truncf %21 : vector<8x128xf32> to vector<8x128xbf16>
    %25 = vector.shape_cast %24 : vector<8x128xbf16> to vector<1x8x128xbf16>
    %26 = vector.shape_cast %25 : vector<1x8x128xbf16> to vector<1x8x128xbf16>
    %27 = vector.broadcast %26 : vector<1x8x128xbf16> to vector<4x8x128xbf16>
    %28 = arith.truncf %21 : vector<8x128xf32> to vector<8x128xbf16>
    %29 = vector.shape_cast %28 : vector<8x128xbf16> to vector<1x8x128xbf16>
    %30 = vector.shape_cast %29 : vector<1x8x128xbf16> to vector<1x8x128xbf16>
    %31 = vector.broadcast %30 : vector<1x8x128xbf16> to vector<4x8x128xbf16>
    %c0_59 = arith.constant 0 : index
    %c0_60 = arith.constant 0 : index
    %c0_61 = arith.constant 0 : index
    %32 = vector.load %arg3[%c0_59, %c0_60, %c0_61] : memref<1x8x128xf32, #tpu.memory_space<vmem>>, vector<1x8x128xf32>
    %33 = vector.shape_cast %32 : vector<1x8x128xf32> to vector<8x128xf32>
    %34 = arith.truncf %33 : vector<8x128xf32> to vector<8x128xbf16>
    %35 = vector.shape_cast %34 : vector<8x128xbf16> to vector<1x8x128xbf16>
    %36 = vector.shape_cast %35 : vector<1x8x128xbf16> to vector<1x8x128xbf16>
    %37 = vector.broadcast %36 : vector<1x8x128xbf16> to vector<4x8x128xbf16>
    %c0_62 = arith.constant 0 : index
    %c0_63 = arith.constant 0 : index
    %c0_64 = arith.constant 0 : index
    %38 = vector.load %arg4[%c0_62, %c0_63, %c0_64] : memref<1x8x8xbf16, #tpu.memory_space<vmem>>, vector<1x8x8xbf16>
    %39 = vector.shape_cast %38 : vector<1x8x8xbf16> to vector<8x8xbf16>
    %c0_65 = arith.constant 0 : index
    %c0_66 = arith.constant 0 : index
    %c0_67 = arith.constant 0 : index
    %40 = vector.load %arg5[%c0_65, %c0_66, %c0_67] : memref<1x8x8xbf16, #tpu.memory_space<vmem>>, vector<1x8x8xbf16>
    %41 = vector.shape_cast %40 : vector<1x8x8xbf16> to vector<8x8xbf16>
    "tpu.trace_start"() <{level = 10 : i32, message = "hqc,hcd->hqd"}> : () -> ()
    %cst = arith.constant dense<0.000000e+00> : vector<4x8x32xf32>
    %42 = tpu.matmul %31, %0, %cst {dimension_numbers = #tpu.dot_dimension_numbers<[2], [1], [1], [2], [0, 0, 0, 1, 1, 2], [0], [0]>} : vector<4x8x128xbf16>, vector<4x128x32xbf16>, vector<4x8x32xf32> -> vector<4x8x32xf32>
    "tpu.trace_stop"() : () -> ()
    %43 = vector.broadcast %1 : vector<4x1x32xf32> to vector<4x8x32xf32>
    %44 = arith.addf %42, %43 : vector<4x8x32xf32>
    %45 = arith.truncf %44 : vector<4x8x32xf32> to vector<4x8x32xbf16>
    "tpu.trace_start"() <{level = 10 : i32, message = "hkc,hcd->hkd"}> : () -> ()
    %cst_68 = arith.constant dense<0.000000e+00> : vector<4x8x32xf32>
    %46 = tpu.matmul %27, %2, %cst_68 {dimension_numbers = #tpu.dot_dimension_numbers<[2], [1], [1], [2], [0, 0, 0, 1, 1, 2], [0], [0]>} : vector<4x8x128xbf16>, vector<4x128x32xbf16>, vector<4x8x32xf32> -> vector<4x8x32xf32>
    "tpu.trace_stop"() : () -> ()
    %47 = vector.broadcast %3 : vector<4x1x32xf32> to vector<4x8x32xf32>
    %48 = arith.addf %46, %47 : vector<4x8x32xf32>
    %49 = arith.truncf %48 : vector<4x8x32xf32> to vector<4x8x32xbf16>
    "tpu.trace_start"() <{level = 10 : i32, message = "hkc,hcd->hkd"}> : () -> ()
    %cst_69 = arith.constant dense<0.000000e+00> : vector<4x8x32xf32>
    %50 = tpu.matmul %27, %4, %cst_69 {dimension_numbers = #tpu.dot_dimension_numbers<[2], [1], [1], [2], [0, 0, 0, 1, 1, 2], [0], [0]>} : vector<4x8x128xbf16>, vector<4x128x32xbf16>, vector<4x8x32xf32> -> vector<4x8x32xf32>
    "tpu.trace_stop"() : () -> ()
    %51 = vector.broadcast %5 : vector<4x1x32xf32> to vector<4x8x32xf32>
    %52 = arith.addf %50, %51 : vector<4x8x32xf32>
    %53 = arith.truncf %52 : vector<4x8x32xf32> to vector<4x8x32xbf16>
    "tpu.trace_start"() <{level = 10 : i32, message = "hqd,hkd->hqk"}> : () -> ()
    %cst_70 = arith.constant dense<0.000000e+00> : vector<4x8x8xf32>
    %54 = tpu.matmul %45, %49, %cst_70 {dimension_numbers = #tpu.dot_dimension_numbers<[2], [2], [1], [1], [0, 0, 0, 1, 1, 1], [0], [0]>} : vector<4x8x32xbf16>, vector<4x8x32xbf16>, vector<4x8x8xf32> -> vector<4x8x8xf32>
    "tpu.trace_stop"() : () -> ()
    %55 = arith.extf %39 : vector<8x8xbf16> to vector<8x8xf32>
    %56 = vector.shape_cast %55 : vector<8x8xf32> to vector<1x8x8xf32>
    %57 = vector.broadcast %56 : vector<1x8x8xf32> to vector<4x8x8xf32>
    %58 = arith.addf %54, %57 : vector<4x8x8xf32>
    %cst_71 = arith.constant dense<0xFF800000> : vector<4x8xf32>
    %59 = vector.multi_reduction <maximumf>, %58, %cst_71 [2] : vector<4x8x8xf32> to vector<4x8xf32>
    %60 = vector.shape_cast %59 : vector<4x8xf32> to vector<4x8x1xf32>
    %61 = vector.broadcast %60 : vector<4x8x1xf32> to vector<4x8x8xf32>
    %62 = arith.subf %58, %61 : vector<4x8x8xf32>
    %63 = math.exp %62 : vector<4x8x8xf32>
    %cst_72 = arith.constant dense<0.000000e+00> : vector<4x8xf32>
    %64 = vector.multi_reduction <add>, %63, %cst_72 [2] : vector<4x8x8xf32> to vector<4x8xf32>
    %65 = vector.shape_cast %64 : vector<4x8xf32> to vector<4x8x1xf32>
    %66 = tpu.reciprocal %65 {approx = true} : vector<4x8x1xf32> -> vector<4x8x1xf32>
    %67 = vector.broadcast %66 : vector<4x8x1xf32> to vector<4x8x8xf32>
    %68 = arith.mulf %63, %67 : vector<4x8x8xf32>
    %69 = arith.truncf %68 : vector<4x8x8xf32> to vector<4x8x8xbf16>
    "tpu.trace_start"() <{level = 10 : i32, message = "hqk,hkd->hqd"}> : () -> ()
    %cst_73 = arith.constant dense<0.000000e+00> : vector<4x8x32xf32>
    %70 = tpu.matmul %69, %53, %cst_73 {dimension_numbers = #tpu.dot_dimension_numbers<[2], [1], [1], [2], [0, 0, 0, 1, 1, 2], [0], [0]>} : vector<4x8x8xbf16>, vector<4x8x32xbf16>, vector<4x8x32xf32> -> vector<4x8x32xf32>
    "tpu.trace_stop"() : () -> ()
    %71 = arith.truncf %70 : vector<4x8x32xf32> to vector<4x8x32xbf16>
    "tpu.trace_start"() <{level = 10 : i32, message = "hqd,hdc->hqc"}> : () -> ()
    %cst_74 = arith.constant dense<0.000000e+00> : vector<4x8x128xf32>
    %72 = tpu.matmul %71, %6, %cst_74 {dimension_numbers = #tpu.dot_dimension_numbers<[2], [1], [1], [2], [0, 0, 0, 1, 1, 2], [0], [0]>} : vector<4x8x32xbf16>, vector<4x32x128xbf16>, vector<4x8x128xf32> -> vector<4x8x128xf32>
    "tpu.trace_stop"() : () -> ()
    %cst_75 = arith.constant dense<0.000000e+00> : vector<8x128xf32>
    %73 = vector.multi_reduction <add>, %72, %cst_75 [0] : vector<4x8x128xf32> to vector<8x128xf32>
    %74 = vector.broadcast %7 : vector<1x128xf32> to vector<8x128xf32>
    %75 = arith.addf %73, %74 : vector<8x128xf32>
    %76 = arith.addf %75, %21 : vector<8x128xf32>
    %77 = vector.broadcast %23 : vector<8x1xf32> to vector<8x128xf32>
    %78 = arith.mulf %76, %77 : vector<8x128xf32>
    %79 = arith.truncf %78 : vector<8x128xf32> to vector<8x128xbf16>
    %80 = vector.shape_cast %79 : vector<8x128xbf16> to vector<1x8x128xbf16>
    %81 = vector.shape_cast %80 : vector<1x8x128xbf16> to vector<1x8x128xbf16>
    %82 = vector.broadcast %81 : vector<1x8x128xbf16> to vector<4x8x128xbf16>
    "tpu.trace_start"() <{level = 10 : i32, message = "hqc,hcd->hqd"}> : () -> ()
    %cst_76 = arith.constant dense<0.000000e+00> : vector<4x8x32xf32>
    %83 = tpu.matmul %82, %8, %cst_76 {dimension_numbers = #tpu.dot_dimension_numbers<[2], [1], [1], [2], [0, 0, 0, 1, 1, 2], [0], [0]>} : vector<4x8x128xbf16>, vector<4x128x32xbf16>, vector<4x8x32xf32> -> vector<4x8x32xf32>
    "tpu.trace_stop"() : () -> ()
    %84 = vector.broadcast %9 : vector<4x1x32xf32> to vector<4x8x32xf32>
    %85 = arith.addf %83, %84 : vector<4x8x32xf32>
    %86 = arith.truncf %85 : vector<4x8x32xf32> to vector<4x8x32xbf16>
    "tpu.trace_start"() <{level = 10 : i32, message = "hkc,hcd->hkd"}> : () -> ()
    %cst_77 = arith.constant dense<0.000000e+00> : vector<4x8x32xf32>
    %87 = tpu.matmul %37, %10, %cst_77 {dimension_numbers = #tpu.dot_dimension_numbers<[2], [1], [1], [2], [0, 0, 0, 1, 1, 2], [0], [0]>} : vector<4x8x128xbf16>, vector<4x128x32xbf16>, vector<4x8x32xf32> -> vector<4x8x32xf32>
    "tpu.trace_stop"() : () -> ()
    %88 = vector.broadcast %11 : vector<4x1x32xf32> to vector<4x8x32xf32>
    %89 = arith.addf %87, %88 : vector<4x8x32xf32>
    %90 = arith.truncf %89 : vector<4x8x32xf32> to vector<4x8x32xbf16>
    "tpu.trace_start"() <{level = 10 : i32, message = "hkc,hcd->hkd"}> : () -> ()
    %cst_78 = arith.constant dense<0.000000e+00> : vector<4x8x32xf32>
    %91 = tpu.matmul %37, %12, %cst_78 {dimension_numbers = #tpu.dot_dimension_numbers<[2], [1], [1], [2], [0, 0, 0, 1, 1, 2], [0], [0]>} : vector<4x8x128xbf16>, vector<4x128x32xbf16>, vector<4x8x32xf32> -> vector<4x8x32xf32>
    "tpu.trace_stop"() : () -> ()
    %92 = vector.broadcast %13 : vector<4x1x32xf32> to vector<4x8x32xf32>
    %93 = arith.addf %91, %92 : vector<4x8x32xf32>
    %94 = arith.truncf %93 : vector<4x8x32xf32> to vector<4x8x32xbf16>
    "tpu.trace_start"() <{level = 10 : i32, message = "hqd,hkd->hqk"}> : () -> ()
    %cst_79 = arith.constant dense<0.000000e+00> : vector<4x8x8xf32>
    %95 = tpu.matmul %86, %90, %cst_79 {dimension_numbers = #tpu.dot_dimension_numbers<[2], [2], [1], [1], [0, 0, 0, 1, 1, 1], [0], [0]>} : vector<4x8x32xbf16>, vector<4x8x32xbf16>, vector<4x8x8xf32> -> vector<4x8x8xf32>
    "tpu.trace_stop"() : () -> ()
    %96 = arith.extf %41 : vector<8x8xbf16> to vector<8x8xf32>
    %97 = vector.shape_cast %96 : vector<8x8xf32> to vector<1x8x8xf32>
    %98 = vector.broadcast %97 : vector<1x8x8xf32> to vector<4x8x8xf32>
    %99 = arith.addf %95, %98 : vector<4x8x8xf32>
    %cst_80 = arith.constant dense<0xFF800000> : vector<4x8xf32>
    %100 = vector.multi_reduction <maximumf>, %99, %cst_80 [2] : vector<4x8x8xf32> to vector<4x8xf32>
    %101 = vector.shape_cast %100 : vector<4x8xf32> to vector<4x8x1xf32>
    %102 = vector.broadcast %101 : vector<4x8x1xf32> to vector<4x8x8xf32>
    %103 = arith.subf %99, %102 : vector<4x8x8xf32>
    %104 = math.exp %103 : vector<4x8x8xf32>
    %cst_81 = arith.constant dense<0.000000e+00> : vector<4x8xf32>
    %105 = vector.multi_reduction <add>, %104, %cst_81 [2] : vector<4x8x8xf32> to vector<4x8xf32>
    %106 = vector.shape_cast %105 : vector<4x8xf32> to vector<4x8x1xf32>
    %107 = tpu.reciprocal %106 {approx = true} : vector<4x8x1xf32> -> vector<4x8x1xf32>
    %108 = vector.broadcast %107 : vector<4x8x1xf32> to vector<4x8x8xf32>
    %109 = arith.mulf %104, %108 : vector<4x8x8xf32>
    %110 = arith.truncf %109 : vector<4x8x8xf32> to vector<4x8x8xbf16>
    "tpu.trace_start"() <{level = 10 : i32, message = "hqk,hkd->hqd"}> : () -> ()
    %cst_82 = arith.constant dense<0.000000e+00> : vector<4x8x32xf32>
    %111 = tpu.matmul %110, %94, %cst_82 {dimension_numbers = #tpu.dot_dimension_numbers<[2], [1], [1], [2], [0, 0, 0, 1, 1, 2], [0], [0]>} : vector<4x8x8xbf16>, vector<4x8x32xbf16>, vector<4x8x32xf32> -> vector<4x8x32xf32>
    "tpu.trace_stop"() : () -> ()
    %112 = arith.truncf %111 : vector<4x8x32xf32> to vector<4x8x32xbf16>
    "tpu.trace_start"() <{level = 10 : i32, message = "hqd,hdc->hqc"}> : () -> ()
    %cst_83 = arith.constant dense<0.000000e+00> : vector<4x8x128xf32>
    %113 = tpu.matmul %112, %14, %cst_83 {dimension_numbers = #tpu.dot_dimension_numbers<[2], [1], [1], [2], [0, 0, 0, 1, 1, 2], [0], [0]>} : vector<4x8x32xbf16>, vector<4x32x128xbf16>, vector<4x8x128xf32> -> vector<4x8x128xf32>
    "tpu.trace_stop"() : () -> ()
    %cst_84 = arith.constant dense<0.000000e+00> : vector<8x128xf32>
    %114 = vector.multi_reduction <add>, %113, %cst_84 [0] : vector<4x8x128xf32> to vector<8x128xf32>
    %115 = vector.broadcast %15 : vector<1x128xf32> to vector<8x128xf32>
    %116 = arith.addf %114, %115 : vector<8x128xf32>
    %117 = arith.addf %116, %78 : vector<8x128xf32>
    %118 = vector.broadcast %23 : vector<8x1xf32> to vector<8x128xf32>
    %119 = arith.mulf %117, %118 : vector<8x128xf32>
    %120 = arith.truncf %119 : vector<8x128xf32> to vector<8x128xbf16>
    %cst_85 = arith.constant dense<0.000000e+00> : vector<8x256xf32>
    %121 = tpu.matmul %120, %16, %cst_85 {dimension_numbers = #tpu.dot_dimension_numbers<[1], [0], [0], [1], [0, 0, 1, 1], [], []>} : vector<8x128xbf16>, vector<128x256xbf16>, vector<8x256xf32> -> vector<8x256xf32>
    %122 = vector.broadcast %17 : vector<1x256xf32> to vector<8x256xf32>
    %123 = arith.addf %121, %122 : vector<8x256xf32>
    %cst_86 = arith.constant 0.000000e+00 : f32
    %124 = vector.broadcast %cst_86 : f32 to vector<8x256xf32>
    %125 = arith.maximumf %123, %124 : vector<8x256xf32>
    %126 = arith.truncf %125 : vector<8x256xf32> to vector<8x256xbf16>
    %cst_87 = arith.constant dense<0.000000e+00> : vector<8x128xf32>
    %127 = tpu.matmul %126, %18, %cst_87 {dimension_numbers = #tpu.dot_dimension_numbers<[1], [0], [0], [1], [0, 0, 1, 1], [], []>} : vector<8x256xbf16>, vector<256x128xbf16>, vector<8x128xf32> -> vector<8x128xf32>
    %128 = vector.broadcast %19 : vector<1x128xf32> to vector<8x128xf32>
    %129 = arith.addf %127, %128 : vector<8x128xf32>
    %130 = arith.addf %129, %78 : vector<8x128xf32>
    %131 = vector.broadcast %23 : vector<8x1xf32> to vector<8x128xf32>
    %132 = arith.mulf %130, %131 : vector<8x128xf32>
    %c0_88 = arith.constant 0 : index
    %c0_89 = arith.constant 0 : index
    %c0_90 = arith.constant 0 : index
    %133 = vector.load %arg27[%c0_88, %c0_89, %c0_90] : memref<1x8x128xf32, #tpu.memory_space<vmem>>, vector<1x8x128xf32>
    %134 = vector.shape_cast %133 : vector<1x8x128xf32> to vector<8x128xf32>
    %135 = vector.shape_cast %132 : vector<8x128xf32> to vector<1x8x128xf32>
    tpu.vector_store %arg27[%c0_88, %c0_89, %c0_90], %135 {strides = array<i32>} : memref<1x8x128xf32, #tpu.memory_space<vmem>>, vector<1x8x128xf32>,
    %c0_i32 = arith.constant 0 : i32
    %136 = arith.cmpi eq, %arg1, %c0_i32 : i32
    %137 = arith.extui %136 : i1 to i32
    %c0_i32_91 = arith.constant 0 : i32
    %138 = arith.cmpi ne, %137, %c0_i32_91 : i32
    scf.if %138 {
      %cst_101 = arith.constant 0.000000e+00 : f32
      %150 = vector.broadcast %cst_101 : f32 to vector<1x1x128xf32>
      %c0_102 = arith.constant 0 : index
      %c0_103 = arith.constant 0 : index
      %c0_104 = arith.constant 0 : index
      %151 = vector.load %arg28[%c0_102, %c0_103, %c0_104] : memref<1x1x128xf32, #tpu.memory_space<vmem>>, vector<1x1x128xf32>
      tpu.vector_store %arg28[%c0_102, %c0_103, %c0_104], %150 {strides = array<i32>} : memref<1x1x128xf32, #tpu.memory_space<vmem>>, vector<1x1x128xf32>,
    } else {
    }
    %c0_92 = arith.constant 0 : index
    %c0_93 = arith.constant 0 : index
    %c0_94 = arith.constant 0 : index
    %139 = vector.load %arg28[%c0_92, %c0_93, %c0_94] : memref<1x1x128xf32, #tpu.memory_space<vmem>>, vector<1x1x128xf32>
    %140 = vector.shape_cast %139 : vector<1x1x128xf32> to vector<1x128xf32>
    %cst_95 = arith.constant dense<0.000000e+00> : vector<128xf32>
    %141 = vector.multi_reduction <add>, %132, %cst_95 [0] : vector<8x128xf32> to vector<128xf32>
    %142 = vector.shape_cast %141 : vector<128xf32> to vector<1x128xf32>
    %143 = arith.addf %140, %142 : vector<1x128xf32>
    %c0_96 = arith.constant 0 : index
    %c0_97 = arith.constant 0 : index
    %c0_98 = arith.constant 0 : index
    %144 = vector.load %arg28[%c0_96, %c0_97, %c0_98] : memref<1x1x128xf32, #tpu.memory_space<vmem>>, vector<1x1x128xf32>
    %145 = vector.shape_cast %144 : vector<1x1x128xf32> to vector<1x128xf32>
    %146 = vector.shape_cast %143 : vector<1x128xf32> to vector<1x1x128xf32>
    tpu.vector_store %arg28[%c0_96, %c0_97, %c0_98], %146 {strides = array<i32>} : memref<1x1x128xf32, #tpu.memory_space<vmem>>, vector<1x1x128xf32>,
    %c0_i32_99 = arith.constant 0 : i32
    %147 = arith.cmpi eq, %arg1, %c0_i32_99 : i32
    %148 = arith.extui %147 : i1 to i32
    %c0_i32_100 = arith.constant 0 : i32
    %149 = arith.cmpi ne, %148, %c0_i32_100 : i32
    scf.if %149 {
      %c0_101 = arith.constant 0 : index
      %c0_102 = arith.constant 0 : index
      %c0_103 = arith.constant 0 : index
      %150 = vector.load %arg28[%c0_101, %c0_102, %c0_103] : memref<1x1x128xf32, #tpu.memory_space<vmem>>, vector<1x1x128xf32>
      %151 = vector.shape_cast %150 : vector<1x1x128xf32> to vector<1x128xf32>
      %cst_104 = arith.constant dense<0.000000e+00> : vector<1xf32>
      %152 = vector.multi_reduction <add>, %23, %cst_104 [0] : vector<8x1xf32> to vector<1xf32>
      %153 = vector.shape_cast %152 : vector<1xf32> to vector<1x1xf32>
      %154 = vector.broadcast %153 : vector<1x1xf32> to vector<1x128xf32>
      %155 = arith.divf %151, %154 : vector<1x128xf32>
      %c0_105 = arith.constant 0 : index
      %c0_106 = arith.constant 0 : index
      %c0_107 = arith.constant 0 : index
      %156 = vector.load %arg28[%c0_105, %c0_106, %c0_107] : memref<1x1x128xf32, #tpu.memory_space<vmem>>, vector<1x1x128xf32>
      %157 = vector.shape_cast %156 : vector<1x1x128xf32> to vector<1x128xf32>
      %158 = vector.shape_cast %155 : vector<1x128xf32> to vector<1x1x128xf32>
      tpu.vector_store %arg28[%c0_105, %c0_106, %c0_107], %158 {strides = array<i32>} : memref<1x1x128xf32, #tpu.memory_space<vmem>>, vector<1x1x128xf32>,
    } else {
    }
    return
  }
  func.func @transform_0(%arg0: i32, %arg1: i32) -> (i32, i32, i32) {
    %c0_i32 = arith.constant 0 : i32
    %c0_i32_0 = arith.constant 0 : i32
    %c0_i32_1 = arith.constant 0 : i32
    return %arg0, %c0_i32, %c0_i32_0 : i32, i32, i32
  }
  func.func @transform_1(%arg0: i32, %arg1: i32) -> (i32, i32, i32) {
    %c0_i32 = arith.constant 0 : i32
    %c0_i32_0 = arith.constant 0 : i32
    %c0_i32_1 = arith.constant 0 : i32
    return %arg0, %c0_i32, %c0_i32_0 : i32, i32, i32
  }
  func.func @transform_2(%arg0: i32, %arg1: i32) -> (i32, i32, i32) {
    %c0_i32 = arith.constant 0 : i32
    %c0_i32_0 = arith.constant 0 : i32
    return %arg0, %arg1, %c0_i32 : i32, i32, i32
  }
  func.func @transform_3(%arg0: i32, %arg1: i32) -> (i32, i32, i32) {
    %c0_i32 = arith.constant 0 : i32
    %c0_i32_0 = arith.constant 0 : i32
    return %arg0, %arg1, %c0_i32 : i32, i32, i32
  }
  func.func @transform_4(%arg0: i32, %arg1: i32) -> (i32, i32, i32) {
    %c0_i32 = arith.constant 0 : i32
    %c0_i32_0 = arith.constant 0 : i32
    %c0_i32_1 = arith.constant 0 : i32
    return %arg0, %c0_i32, %c0_i32_0 : i32, i32, i32
  }
  func.func @transform_5(%arg0: i32, %arg1: i32) -> (i32, i32, i32) {
    %c0_i32 = arith.constant 0 : i32
    %c0_i32_0 = arith.constant 0 : i32
    %c0_i32_1 = arith.constant 0 : i32
    %c0_i32_2 = arith.constant 0 : i32
    return %c0_i32, %c0_i32_0, %c0_i32_1 : i32, i32, i32
  }
  func.func @transform_6(%arg0: i32, %arg1: i32) -> (i32, i32, i32) {
    %c0_i32 = arith.constant 0 : i32
    %c0_i32_0 = arith.constant 0 : i32
    %c0_i32_1 = arith.constant 0 : i32
    %c0_i32_2 = arith.constant 0 : i32
    return %c0_i32, %c0_i32_0, %c0_i32_1 : i32, i32, i32
  }
  func.func @transform_7(%arg0: i32, %arg1: i32) -> (i32, i32, i32) {
    %c0_i32 = arith.constant 0 : i32
    %c0_i32_0 = arith.constant 0 : i32
    %c0_i32_1 = arith.constant 0 : i32
    %c0_i32_2 = arith.constant 0 : i32
    return %c0_i32, %c0_i32_0, %c0_i32_1 : i32, i32, i32
  }
  func.func @transform_8(%arg0: i32, %arg1: i32) -> (i32, i32, i32) {
    %c0_i32 = arith.constant 0 : i32
    %c0_i32_0 = arith.constant 0 : i32
    %c0_i32_1 = arith.constant 0 : i32
    %c0_i32_2 = arith.constant 0 : i32
    return %c0_i32, %c0_i32_0, %c0_i32_1 : i32, i32, i32
  }
  func.func @transform_9(%arg0: i32, %arg1: i32) -> (i32, i32, i32) {
    %c0_i32 = arith.constant 0 : i32
    %c0_i32_0 = arith.constant 0 : i32
    %c0_i32_1 = arith.constant 0 : i32
    %c0_i32_2 = arith.constant 0 : i32
    return %c0_i32, %c0_i32_0, %c0_i32_1 : i32, i32, i32
  }
  func.func @transform_10(%arg0: i32, %arg1: i32) -> (i32, i32, i32) {
    %c0_i32 = arith.constant 0 : i32
    %c0_i32_0 = arith.constant 0 : i32
    %c0_i32_1 = arith.constant 0 : i32
    %c0_i32_2 = arith.constant 0 : i32
    return %c0_i32, %c0_i32_0, %c0_i32_1 : i32, i32, i32
  }
  func.func @transform_11(%arg0: i32, %arg1: i32) -> (i32, i32, i32) {
    %c0_i32 = arith.constant 0 : i32
    %c0_i32_0 = arith.constant 0 : i32
    %c0_i32_1 = arith.constant 0 : i32
    %c0_i32_2 = arith.constant 0 : i32
    return %c0_i32, %c0_i32_0, %c0_i32_1 : i32, i32, i32
  }
  func.func @transform_12(%arg0: i32, %arg1: i32) -> (i32, i32) {
    %c0_i32 = arith.constant 0 : i32
    %c0_i32_0 = arith.constant 0 : i32
    %c0_i32_1 = arith.constant 0 : i32
    return %c0_i32, %c0_i32_0 : i32, i32
  }
  func.func @transform_13(%arg0: i32, %arg1: i32) -> (i32, i32, i32) {
    %c0_i32 = arith.constant 0 : i32
    %c0_i32_0 = arith.constant 0 : i32
    %c0_i32_1 = arith.constant 0 : i32
    %c0_i32_2 = arith.constant 0 : i32
    return %c0_i32, %c0_i32_0, %c0_i32_1 : i32, i32, i32
  }
  func.func @transform_14(%arg0: i32, %arg1: i32) -> (i32, i32, i32) {
    %c0_i32 = arith.constant 0 : i32
    %c0_i32_0 = arith.constant 0 : i32
    %c0_i32_1 = arith.constant 0 : i32
    %c0_i32_2 = arith.constant 0 : i32
    return %c0_i32, %c0_i32_0, %c0_i32_1 : i32, i32, i32
  }
  func.func @transform_15(%arg0: i32, %arg1: i32) -> (i32, i32, i32) {
    %c0_i32 = arith.constant 0 : i32
    %c0_i32_0 = arith.constant 0 : i32
    %c0_i32_1 = arith.constant 0 : i32
    %c0_i32_2 = arith.constant 0 : i32
    return %c0_i32, %c0_i32_0, %c0_i32_1 : i32, i32, i32
  }
  func.func @transform_16(%arg0: i32, %arg1: i32) -> (i32, i32, i32) {
    %c0_i32 = arith.constant 0 : i32
    %c0_i32_0 = arith.constant 0 : i32
    %c0_i32_1 = arith.constant 0 : i32
    %c0_i32_2 = arith.constant 0 : i32
    return %c0_i32, %c0_i32_0, %c0_i32_1 : i32, i32, i32
  }
  func.func @transform_17(%arg0: i32, %arg1: i32) -> (i32, i32, i32) {
    %c0_i32 = arith.constant 0 : i32
    %c0_i32_0 = arith.constant 0 : i32
    %c0_i32_1 = arith.constant 0 : i32
    %c0_i32_2 = arith.constant 0 : i32
    return %c0_i32, %c0_i32_0, %c0_i32_1 : i32, i32, i32
  }
  func.func @transform_18(%arg0: i32, %arg1: i32) -> (i32, i32, i32) {
    %c0_i32 = arith.constant 0 : i32
    %c0_i32_0 = arith.constant 0 : i32
    %c0_i32_1 = arith.constant 0 : i32
    %c0_i32_2 = arith.constant 0 : i32
    return %c0_i32, %c0_i32_0, %c0_i32_1 : i32, i32, i32
  }
  func.func @transform_19(%arg0: i32, %arg1: i32) -> (i32, i32, i32) {
    %c0_i32 = arith.constant 0 : i32
    %c0_i32_0 = arith.constant 0 : i32
    %c0_i32_1 = arith.constant 0 : i32
    %c0_i32_2 = arith.constant 0 : i32
    return %c0_i32, %c0_i32_0, %c0_i32_1 : i32, i32, i32
  }
  func.func @transform_20(%arg0: i32, %arg1: i32) -> (i32, i32) {
    %c0_i32 = arith.constant 0 : i32
    %c0_i32_0 = arith.constant 0 : i32
    %c0_i32_1 = arith.constant 0 : i32
    return %c0_i32, %c0_i32_0 : i32, i32
  }
  func.func @transform_21(%arg0: i32, %arg1: i32) -> (i32, i32) {
    %c0_i32 = arith.constant 0 : i32
    %c0_i32_0 = arith.constant 0 : i32
    %c0_i32_1 = arith.constant 0 : i32
    return %c0_i32, %c0_i32_0 : i32, i32
  }
  func.func @transform_22(%arg0: i32, %arg1: i32) -> (i32, i32) {
    %c0_i32 = arith.constant 0 : i32
    %c0_i32_0 = arith.constant 0 : i32
    %c0_i32_1 = arith.constant 0 : i32
    return %c0_i32, %c0_i32_0 : i32, i32
  }
  func.func @transform_23(%arg0: i32, %arg1: i32) -> (i32, i32) {
    %c0_i32 = arith.constant 0 : i32
    %c0_i32_0 = arith.constant 0 : i32
    %c0_i32_1 = arith.constant 0 : i32
    return %c0_i32, %c0_i32_0 : i32, i32
  }
  func.func @transform_24(%arg0: i32, %arg1: i32) -> (i32, i32) {
    %c0_i32 = arith.constant 0 : i32
    %c0_i32_0 = arith.constant 0 : i32
    %c0_i32_1 = arith.constant 0 : i32
    return %c0_i32, %c0_i32_0 : i32, i32
  }
  func.func @transform_25(%arg0: i32, %arg1: i32) -> (i32, i32, i32) {
    %c0_i32 = arith.constant 0 : i32
    %c0_i32_0 = arith.constant 0 : i32
    return %arg0, %arg1, %c0_i32 : i32, i32, i32
  }
  func.func @transform_26(%arg0: i32, %arg1: i32) -> (i32, i32, i32) {
    %c0_i32 = arith.constant 0 : i32
    %c0_i32_0 = arith.constant 0 : i32
    %c0_i32_1 = arith.constant 0 : i32
    return %arg0, %c0_i32, %c0_i32_0 : i32, i32, i32
  }
}

</mosaic_0001>

<bundles_post_ra>
// kernel: tpu_custom_call.1
= control target key start
LH: loop header
LB: loop body
LE: loop exit
PB: predicated region body
PF: predicated region fallthrough
CT: control target
= control target key end

     0   :  { %s6804_s0 = inlined_call_operand.vmem [shape: f32[2,8,128], index: 0, kind: input, shape index: {}]   ;;  %s6805_s1 = inlined_call_operand.vmem [shape: f32[2,8,128], index: 1, kind: input, shape index: {}]   ;;  %s6806_s2 = inlined_call_operand.vmem [shape: bf16[2,8,8], index: 2, kind: input, shape index: {}]   ;;  %s6807_s3 = inlined_call_operand.vmem [shape: bf16[2,8,8], index: 3, kind: input, shape index: {}]   ;;  %s6808_s4 = inlined_call_operand.vmem [shape: f32[2,8,1], index: 4, kind: input, shape index: {}]   ;;  %s6809_s5 = inlined_call_operand.vmem [shape: bf16[4,128,32], index: 5, kind: input, shape index: {}]   ;;  %s6810_s6 = inlined_call_operand.vmem [shape: f32[4,1,32], index: 6, kind: input, shape index: {}]   ;;  %s6811_s7 = inlined_call_operand.vmem [shape: bf16[4,128,32], index: 7, kind: input, shape index: {}]   ;;  %s6812_s8 = inlined_call_operand.vmem [shape: f32[4,1,32], index: 8, kind: input, shape index: {}]   ;;  %s6813_s9 = inlined_call_operand.vmem [shape: bf16[4,128,32], index: 9, kind: input, shape index: {}]   ;;  %s6814_s10 = inlined_call_operand.vmem [shape: f32[4,1,32], index: 10, kind: input, shape index: {}]   ;;  %s6815_s11 = inlined_call_operand.vmem [shape: bf16[4,32,128], index: 11, kind: input, shape index: {}]   ;;  %s6816_s12 = inlined_call_operand.vmem [shape: f32[1,128], index: 12, kind: input, shape index: {}]   ;;  %s6817_s13 = inlined_call_operand.vmem [shape: bf16[4,128,32], index: 13, kind: input, shape index: {}]   ;;  %s6818_s14 = inlined_call_operand.vmem [shape: f32[4,1,32], index: 14, kind: input, shape index: {}]   ;;  %s6819_s15 = inlined_call_operand.vmem [shape: bf16[4,128,32], index: 15, kind: input, shape index: {}]   ;;  %s6820_s16 = inlined_call_operand.vmem [shape: f32[4,1,32], index: 16, kind: input, shape index: {}]   ;;  %s6821_s17 = inlined_call_operand.vmem [shape: bf16[4,128,32], index: 17, kind: input, shape index: {}]   ;;  %s6822_s18 = inlined_call_operand.vmem [shape: f32[4,1,32], index: 18, kind: input, shape index: {}]   ;;  %s6823_s19 = inlined_call_operand.vmem [shape: bf16[4,32,128], index: 19, kind: input, shape index: {}]   ;;  %s6824_s20 = inlined_call_operand.vmem [shape: f32[1,128], index: 20, kind: input, shape index: {}]   ;;  %s6825_s21 = inlined_call_operand.vmem [shape: bf16[128,256], index: 21, kind: input, shape index: {}]   ;;  %s6826_s22 = inlined_call_operand.vmem [shape: f32[1,256], index: 22, kind: input, shape index: {}]   ;;  %s6827_s23 = inlined_call_operand.vmem [shape: bf16[256,128], index: 23, kind: input, shape index: {}]   ;;  %s6828_s24 = inlined_call_operand.vmem [shape: f32[1,128], index: 24, kind: input, shape index: {}]   ;;  %s6829_s25 = inlined_call_operand.hbm [shape: f32[2,8,128], index: 25, kind: output, shape index: {0}]   ;;  %s6830_s26 = inlined_call_operand.hbm [shape: f32[2,1,128], index: 26, kind: output, shape index: {1}]  }
   0x1   :  { %6854 = sst [smem:[#allocation17_spill]] %s6804_s0 }
   0x2   :  { %6855 = sst [smem:[#allocation18_spill]] %s6805_s1 }
   0x3   :  { %6856 = sst [smem:[#allocation19_spill]] %s6806_s2 }
   0x4   :  { %6857 = sst [smem:[#allocation20_spill]] %s6807_s3 }
   0x5   :  { %6858 = sst [smem:[#allocation21_spill]] %s6808_s4 }
   0x6   :  { %6859 = sst [smem:[#allocation22_spill]] %s6809_s5 }
   0x7   :  { %6860 = sst [smem:[#allocation23_spill]] %s6810_s6 }
   0x8   :  { %6861 = sst [smem:[#allocation24_spill]] %s6811_s7 }
   0x9   :  { %6862 = sst [smem:[#allocation25_spill]] %s6812_s8 }
   0xa   :  { %6863 = sst [smem:[#allocation26_spill]] %s6813_s9 }
   0xb   :  { %6864 = sst [smem:[#allocation27_spill]] %s6814_s10 }
   0xc   :  { %6865 = sst [smem:[#allocation28_spill]] %s6815_s11 }
   0xd   :  { %6866 = sst [smem:[#allocation29_spill]] %s6816_s12 }
   0xe   :  { %6867 = sst [smem:[#allocation30_spill]] %s6817_s13 }
   0xf   :  { %6868 = sst [smem:[#allocation31_spill]] %s6828_s24 }
  0x10   :  { %6869 = sst [smem:[#allocation32_spill]] %s6829_s25 }
  0x11   :  { %6870 = sst [smem:[#allocation33_spill]] %s6830_s26 }
  0x12   :  { %32 = vsyncpa [#allocation3], 0 }
  0x13   :  { %34 = vsyncpa [#allocation3 + $0x1], 0 }
  0x14   :  { %35 = vsyncpa [#allocation5], 0 }
  0x15   :  { %37 = vsyncpa [#allocation5 + $0x1], 0  ;;  %s5712_s27 = smov 0   ;;  %s5714_s3 = smov 0  }
  0x16   :  { %s5716_s7 = smov 0   ;;  %s5718_s28 = smov 0  }
  0x17   :  { %s5720_s8 = smov 0   ;;  %s5722_s4 = smov 0  }
  0x18 LB: > { %6871 = sst [smem:[#allocation8_spill]] %s5553_s27  ;;  %s4097_s29 = sadd.s32 4294967295, %s5573_s4   ;;  %s5573_s4 = sphi %s5722_s4, %s43_s4   ;;  %s5569_s8 = sphi %s5720_s8, %s6913_s8   ;;  %s5565_s28 = sphi %s5718_s28, %s6912_s28   ;;  %s5561_s7 = sphi %s5716_s7, %s6911_s7   ;;  %s5557_s3 = sphi %s5714_s3, %s6915_s3   ;;  %s5553_s27 = sphi %s5712_s27, %s6914_s27  }
  0x19   : > { %6872 = sst [smem:[#allocation9_spill]] %s5561_s7  ;;  %s4098_s0 = sadd.s32 4294967294, %s5573_s4  }
  0x1a   : > { %6873 = sst [smem:[#allocation10_spill]] %s5565_s28  ;;  %s55_s9 = sadd.s32 1, %s5569_s8 }
  0x1b   : > { %6874 = sst [smem:[#allocation11_spill]] %s5569_s8  ;;  %s618_s30 = sadd.s32 1, %s5561_s7 }
  0x1c   : > { %6875 = sst [smem:[#allocation12_spill]] %s5573_s4  ;;  %p57_p0 = scmp.ge.s32.totalorder %s55_s9, 2 }
  0x1d   : > { %p628_p1 = scmp.ne.s32.totalorder %s5561_s7, %s5557_s3  ;;  %p629_p2 = scmp.eq.s32.totalorder %s4097_s29, 1 }
  0x1e   : > { %p634_p3 = scmp.ne.s32.totalorder %s5557_s3, %s5553_s27  ;;  %s6917_s9 = smov (%p57_p0, %s55_s9), 0 }
  0x1f   : > { %6876 = sst [smem:[#allocation13_spill]] %s6917_s9  ;;  %p5752_p4 = por %p629_p2, %p628_p1 }
  0x20   : > { %p635_p5 = scmp.eq.s32.totalorder %s4098_s0, 1  ;;  %s613_s5 = ssub.s32 %s5569_s8, %s6917_s9 }
  0x21   : > { %s6877_s2 = scalar_select %p5752_p4, 1, 0 }
  0x22   : > { %p4101_p6 = scmp.ge.s32.totalorder %s5573_s4, 1  ;;  %p616_p7 = scmp.eq.s32.totalorder %s613_s5, 0 }
  0x23   : > { %6878 = sst [smem:[#allocation14_spill]] %s6877_s2  ;;  %p5759_p8 = por %p635_p5, %p634_p3 }
  0x24   : > { %p780_p9 = scmp.lt.s32.totalorder %s5573_s4, 3 }
  0x25   : > { %s6879_s10 = scalar_select %p5759_p8, 1, 0 }
  0x26   : > { %s5765_s6 = scalar_select %p616_p7, %s5561_s7, %s618_s30  }
  0x27   : > { %6880 = sst [smem:[#allocation15_spill]] %s6879_s10  ;;  %p781_p10 = pnand %p4101_p6, %p780_p9 }
  0x28   : > { %6881 = sst [smem:[#allocation16_spill]] %s5765_s6  ;;  %p875_p11 = scmp.lt.s32.totalorder (!%p781_p10), %s5565_s28, 1 }
  0x29   : > { %784 = sbr.rel (%p781_p10) target bundleno = 2060 (0x80c), region = 120  ;;  %s6882_s27 = sld [smem:[#allocation22_spill]] (!%p781_p10) }
  0x2a   : > { %s6884_s10 = sld [smem:[#allocation17_spill]] (!%p781_p10) }
  0x2b   : > { %s6885_s29 = sld [smem:[#allocation24_spill]] (!%p781_p10) }
  0x2c   : > { %s6886_s9 = sld [smem:[#allocation26_spill]] (!%p781_p10) }
  0x2d   : > { %s6891_s7 = sld [smem:[#allocation27_spill]] (!%p781_p10) }
  0x2e   : > { %vm2182_vm0 = vcmask 261120   ;;  %vm2311_vm1 = vcmask 1043456   ;;  %vm2259_vm2 = vcmask 64512   ;;  %s6894_s11 = sld [smem:[#allocation28_spill]]  ;;  %vm3884_vm3 = vcmask 7168  }
  0x2f   : > { %s6883_s26 = smov %s6882_s27  ;;  %v5103_v0 = vld [vmem:[%s6882_s27 + $0x38] sm:$0xff]  ;;  %s6895_s5 = sld [smem:[#allocation21_spill]] }
  0x30   : > { %v5111_v1 = vld [vmem:[%s6883_s26 + $0x78] sm:$0xff]  ;;  %1461 = vmatpush.bf16.msra.mxu0 %v5103_v0  ;;  %v5102_v4 = vld [vmem:[%s6883_s26 + $0x30] sm:$0xff]  ;;  %v5101_v8 = vld [vmem:[%s6883_s26 + $0x28] sm:$0xff]  ;;  %s5835_s27 = scalar_select %p875_p11, %s5565_s28, 1 }
  0x31   : > { %v5119_v2 = vld [vmem:[%s6883_s26 + $0xb8] sm:$0xff]  ;;  %1522 = vmatpush.bf16.msra.mxu1 %v5111_v1  ;;  %v5110_v5 = vld [vmem:[%s6883_s26 + $0x70] sm:$0xff]  ;;  %v5109_v9 = vld [vmem:[%s6883_s26 + $0x68] sm:$0xff]  ;;  %s6887_s28 = sld [smem:[#allocation25_spill]] }
  0x32   : > { %v5127_v3 = vld [vmem:[%s6883_s26 + $0xf8] sm:$0xff]  ;;  %1583 = vmatpush.bf16.msra.mxu2 %v5119_v2  ;;  %v5118_v6 = vld [vmem:[%s6883_s26 + $0xb0] sm:$0xff]  ;;  %v5117_v10 = vld [vmem:[%s6883_s26 + $0xa8] sm:$0xff]  ;;  %s5850_s30 = sshll.u32 %s5835_s27, 3  ;;  %s6850_s8 = sshll.u32 %s5835_s27, 2 }
  0x33   : > { %1644 = vmatpush.bf16.msra.mxu3 %v5127_v3  ;;  %v5126_v7 = vld [vmem:[%s6883_s26 + $0xf0] sm:$0xff]  ;;  %v5125_v11 = vld [vmem:[%s6883_s26 + $0xe8] sm:$0xff]  ;;  %v5100_v12 = vld [vmem:[%s6883_s26 + $0x20] sm:$0xff]  ;;  %s878_s4 = scalar_lea.vmem %s6884_s10, %s5850_s30  ;;  %s6892_s10 = smov %s6891_s7 }
  0x34   : > { %1462 = vmatpush.bf16.msra.mxu0 %v5102_v4  ;;  %v5108_v13 = vld [vmem:[%s6883_s26 + $0x60] sm:$0xff]  ;;  %v5099_v16 = vld [vmem:[%s6883_s26 + $0x18] sm:$0xff]  ;;  %v5098_v20 = vld [vmem:[%s6883_s26 + $0x10] sm:$0xff]  ;;  %s6896_s13 = sld [smem:[#allocation30_spill]]  ;;  %s6899_s24 = sshll.u32 %s5835_s27, 2 }
  0x35   : > { %1523 = vmatpush.bf16.msra.mxu1 %v5110_v5  ;;  %v5116_v14 = vld [vmem:[%s6883_s26 + $0xa0] sm:$0xff]  ;;  %v5107_v17 = vld [vmem:[%s6883_s26 + $0x58] sm:$0xff]  ;;  %v5106_v21 = vld [vmem:[%s6883_s26 + $0x50] sm:$0xff]  ;;  %s6178_s1 = scalar_lea.vmem %s6895_s5, %s5850_s30  ;;  %s6897_s12 = sld [smem:[#allocation29_spill]] }
  0x36   : > { %1584 = vmatpush.bf16.msra.mxu2 %v5118_v6  ;;  %v5124_v15 = vld [vmem:[%s6883_s26 + $0xe0] sm:$0xff]  ;;  %v5115_v18 = vld [vmem:[%s6883_s26 + $0x98] sm:$0xff]  ;;  %v5114_v22 = vld [vmem:[%s6883_s26 + $0x90] sm:$0xff] }
  0x37   : > { %1645 = vmatpush.bf16.msra.mxu3 %v5126_v7  ;;  %v5123_v19 = vld [vmem:[%s6883_s26 + $0xd8] sm:$0xff]  ;;  %v5122_v23 = vld [vmem:[%s6883_s26 + $0xd0] sm:$0xff]  ;;  %v5097_v24 = vld [vmem:[%s6883_s26 + $0x8] sm:$0xff]  ;;  %s6888_s2 = smov %s6887_s28 }
  0x38   : > { %1463 = vmatpush.bf16.msra.mxu0 %v5101_v8  ;;  %v5105_v25 = vld [vmem:[%s6883_s26 + $0x48] sm:$0xff]  ;;  %v5096_v28 = vld [vmem:[%s6883_s26] sm:$0xff]  ;;  %v5135_v32 = vld [vmem:[%s6885_s29 + $0x38] sm:$0xff] }
  0x39   : > { %1524 = vmatpush.bf16.msra.mxu1 %v5109_v9  ;;  %v5113_v26 = vld [vmem:[%s6883_s26 + $0x88] sm:$0xff]  ;;  %v5104_v29 = vld [vmem:[%s6883_s26 + $0x40] sm:$0xff]  ;;  %v5143_v33 = vld [vmem:[%s6885_s29 + $0x78] sm:$0xff] }
  0x3a   : > { %1585 = vmatpush.bf16.msra.mxu2 %v5117_v10  ;;  %v5121_v27 = vld [vmem:[%s6883_s26 + $0xc8] sm:$0xff]  ;;  %v5112_v30 = vld [vmem:[%s6883_s26 + $0x80] sm:$0xff]  ;;  %v5151_v34 = vld [vmem:[%s6885_s29 + $0xb8] sm:$0xff] }
  0x3b   : > { %1646 = vmatpush.bf16.msra.mxu3 %v5125_v11  ;;  %v5120_v31 = vld [vmem:[%s6883_s26 + $0xc0] sm:$0xff]  ;;  %v5159_v35 = vld [vmem:[%s6885_s29 + $0xf8] sm:$0xff]  ;;  %v5134_v38 = vld [vmem:[%s6885_s29 + $0x30] sm:$0xff] }
  0x3c   : > { %1464 = vmatpush.bf16.msra.mxu0 %v5100_v12  ;;  %v5886_v36 = vld [vmem:[%s878_s4] sm:$0xff]  ;;  %v5142_v39 = vld [vmem:[%s6885_s29 + $0x70] sm:$0xff]  ;;  %v5133_v42 = vld [vmem:[%s6885_s29 + $0x28] sm:$0xff]  ;;  %s6889_s4 = sld [smem:[#allocation23_spill]] }
  0x3d   : > { %1525 = vmatpush.bf16.msra.mxu1 %v5108_v13  ;;  %v5890_v37 = vpack.c.bf16 %v5886_v36, %v5886_v36  ;;  %v5150_v40 = vld [vmem:[%s6885_s29 + $0xb0] sm:$0xff]  ;;  %v5141_v43 = vld [vmem:[%s6885_s29 + $0x68] sm:$0xff]  ;;  %v5132_v46 = vld [vmem:[%s6885_s29 + $0x20] sm:$0xff] }
  0x3e   : > { %1586 = vmatpush.bf16.msra.mxu2 %v5116_v14  ;;  %v5158_v41 = vld [vmem:[%s6885_s29 + $0xf0] sm:$0xff]  ;;  %v5149_v44 = vld [vmem:[%s6885_s29 + $0xa8] sm:$0xff]  ;;  %v5140_v47 = vld [vmem:[%s6885_s29 + $0x60] sm:$0xff] }
  0x3f   : > { %1647 = vmatpush.bf16.msra.mxu3 %v5124_v15  ;;  %v5157_v45 = vld [vmem:[%s6885_s29 + $0xe8] sm:$0xff]  ;;  %v5148_v48 = vld [vmem:[%s6885_s29 + $0xa0] sm:$0xff]  ;;  %v5131_v50 = vld [vmem:[%s6885_s29 + $0x18] sm:$0xff] }
  0x40   : > { %1465 = vmatpush.bf16.msra.mxu0 %v5099_v16  ;;  %v5156_v49 = vld [vmem:[%s6885_s29 + $0xe0] sm:$0xff]  ;;  %v5139_v51 = vld [vmem:[%s6885_s29 + $0x58] sm:$0xff]  ;;  %v5130_v54 = vld [vmem:[%s6885_s29 + $0x10] sm:$0xff] }
  0x41   : > { %1526 = vmatpush.bf16.msra.mxu1 %v5107_v17  ;;  %v5147_v52 = vld [vmem:[%s6885_s29 + $0x98] sm:$0xff]  ;;  %v5138_v55 = vld [vmem:[%s6885_s29 + $0x50] sm:$0xff]  ;;  %v5129_v58 = vld [vmem:[%s6885_s29 + $0x8] sm:$0xff] }
  0x42   : > { %1587 = vmatpush.bf16.msra.mxu2 %v5115_v18  ;;  %v5155_v53 = vld [vmem:[%s6885_s29 + $0xd8] sm:$0xff]  ;;  %v5146_v56 = vld [vmem:[%s6885_s29 + $0x90] sm:$0xff]  ;;  %v5137_v59 = vld [vmem:[%s6885_s29 + $0x48] sm:$0xff]  ;;  %s6890_s25 = smov %s6889_s4 }
  0x43   : > { %1648 = vmatpush.bf16.msra.mxu3 %v5123_v19  ;;  %v5154_v57 = vld [vmem:[%s6885_s29 + $0xd0] sm:$0xff]  ;;  %v5145_v60 = vld [vmem:[%s6885_s29 + $0x88] sm:$0xff]  ;;  %v5128_v62 = vld [vmem:[%s6885_s29] sm:$0xff] }
  0x44   : > { %1466 = vmatpush.bf16.msra.mxu0 %v5098_v20  ;;  %v5153_v61 = vld [vmem:[%s6885_s29 + $0xc8] sm:$0xff]  ;;  %v5136_v63 = vld [vmem:[%s6885_s29 + $0x40] sm:$0xff]  ;;  %v5183_v2 = vld [vmem:[%s6886_s9 + $0xb8] sm:$0xff] }
  0x45   : > { %1527 = vmatpush.bf16.msra.mxu1 %v5106_v21  ;;  %v5144_v0 = vld [vmem:[%s6885_s29 + $0x80] sm:$0xff]  ;;  %v5167_v3 = vld [vmem:[%s6886_s9 + $0x38] sm:$0xff]  ;;  %v5182_v6 = vld [vmem:[%s6886_s9 + $0xb0] sm:$0xff] }
  0x46   : > { %1588 = vmatpush.bf16.msra.mxu2 %v5114_v22  ;;  %v5152_v1 = vld [vmem:[%s6885_s29 + $0xc0] sm:$0xff]  ;;  %v5175_v4 = vld [vmem:[%s6886_s9 + $0x78] sm:$0xff]  ;;  %v5166_v7 = vld [vmem:[%s6886_s9 + $0x30] sm:$0xff] }
  0x47   : > { %1649 = vmatpush.bf16.msra.mxu3 %v5122_v23  ;;  %v5191_v5 = vld [vmem:[%s6886_s9 + $0xf8] sm:$0xff]  ;;  %v5174_v8 = vld [vmem:[%s6886_s9 + $0x70] sm:$0xff]  ;;  %v5181_v10 = vld [vmem:[%s6886_s9 + $0xa8] sm:$0xff] }
  0x48   : > { %1467 = vmatpush.bf16.msra.mxu0 %v5097_v24  ;;  %v5190_v9 = vld [vmem:[%s6886_s9 + $0xf0] sm:$0xff]  ;;  %v5165_v11 = vld [vmem:[%s6886_s9 + $0x28] sm:$0xff]  ;;  %v5180_v14 = vld [vmem:[%s6886_s9 + $0xa0] sm:$0xff] }
  0x49   : > { %1528 = vmatpush.bf16.msra.mxu1 %v5105_v25  ;;  %v5173_v12 = vld [vmem:[%s6886_s9 + $0x68] sm:$0xff]  ;;  %v5164_v15 = vld [vmem:[%s6886_s9 + $0x20] sm:$0xff]  ;;  %v5179_v17 = vld [vmem:[%s6886_s9 + $0x98] sm:$0xff] }
  0x4a   : > { %1589 = vmatpush.bf16.msra.mxu2 %v5113_v26  ;;  %v5189_v13 = vld [vmem:[%s6886_s9 + $0xe8] sm:$0xff]  ;;  %v5172_v16 = vld [vmem:[%s6886_s9 + $0x60] sm:$0xff]  ;;  %v5163_v18 = vld [vmem:[%s6886_s9 + $0x18] sm:$0xff] }
  0x4b   : > { %1650 = vmatpush.bf16.msra.mxu3 %v5121_v27  ;;  %v5171_v19 = vld [vmem:[%s6886_s9 + $0x58] sm:$0xff]  ;;  %v5178_v20 = vld [vmem:[%s6886_s9 + $0x90] sm:$0xff]  ;;  %v5188_v21 = vld [vmem:[%s6886_s9 + $0xe0] sm:$0xff] }
  0x4c   : > { %1468 = vmatpush.bf16.msra.mxu0 %v5096_v28  ;;  %v5162_v22 = vld [vmem:[%s6886_s9 + $0x10] sm:$0xff]  ;;  %v5177_v24 = vld [vmem:[%s6886_s9 + $0x88] sm:$0xff]  ;;  %v5187_v25 = vld [vmem:[%s6886_s9 + $0xd8] sm:$0xff] }
  0x4d   : > { %1529 = vmatpush.bf16.msra.mxu1 %v5104_v29  ;;  %v5170_v23 = vld [vmem:[%s6886_s9 + $0x50] sm:$0xff]  ;;  %v5161_v26 = vld [vmem:[%s6886_s9 + $0x8] sm:$0xff]  ;;  %v5176_v28 = vld [vmem:[%s6886_s9 + $0x80] sm:$0xff] }
  0x4e   : > { %1590 = vmatpush.bf16.msra.mxu2 %v5112_v30  ;;  %v5169_v27 = vld [vmem:[%s6886_s9 + $0x48] sm:$0xff]  ;;  %v5186_v29 = vld [vmem:[%s6886_s9 + $0xd0] sm:$0xff]  ;;  %v5160_v30 = vld [vmem:[%s6886_s9] sm:$0xff] }
  0x4f   : > { %1651 = vmatpush.bf16.msra.mxu3 %v5120_v31  ;;  %1469 = vmatmul.bf16.vlgmr.msra.gmra.mxu0 %v5890_v37  ;;  %v5168_v31 = vld [vmem:[%s6886_s9 + $0x40] sm:$0xff] }
  0x50   : > { %1721 = vmatpush.bf16.msrb.mxu0 %v5135_v32  ;;  %1530 = vmatmul.bf16.vlgmr.msra.gmra.mxu1 %v5890_v37  ;;  %v5185_v32 = vld [vmem:[%s6886_s9 + $0xc8] sm:$0xff] }
  0x51   : > { %1782 = vmatpush.bf16.msrb.mxu1 %v5143_v33  ;;  %1591 = vmatmul.bf16.vlgmr.msra.gmra.mxu2 %v5890_v37  ;;  %v5184_v33 = vld [vmem:[%s6886_s9 + $0xc0] sm:$0xff] }
  0x52   : > { %1843 = vmatpush.bf16.msrb.mxu2 %v5151_v34  ;;  %1652 = vmatmul.bf16.vlgmr.msra.gmra.mxu3 %v5890_v37 }
  0x53   : > { %1904 = vmatpush.bf16.msrb.mxu3 %v5159_v35 }
  0x54   : > { %1722 = vmatpush.bf16.msrb.mxu0 %v5134_v38 }
  0x55   : > { %1783 = vmatpush.bf16.msrb.mxu1 %v5142_v39 }
  0x56   : > { %1844 = vmatpush.bf16.msrb.mxu2 %v5150_v40 }
  0x57   : > { %1905 = vmatpush.bf16.msrb.mxu3 %v5158_v41 }
  0x58   : > { %1723 = vmatpush.bf16.msrb.mxu0 %v5133_v42 }
  0x59   : > { %1784 = vmatpush.bf16.msrb.mxu1 %v5141_v43 }
  0x5a   : > { %1845 = vmatpush.bf16.msrb.mxu2 %v5149_v44  ;;  %v5405_v44 = vld [vmem:[%s6887_s28] ss:$0 sm:$0xff]  ;;  %s6893_s28 = sld [smem:[#allocation19_spill]] }
  0x5b   : > { %1906 = vmatpush.bf16.msrb.mxu3 %v5157_v45  ;;  %v5406_v45 = vld [vmem:[%s6888_s2 + $0x1] ss:$0 sm:$0xff] }
  0x5c   : > { %1724 = vmatpush.bf16.msrb.mxu0 %v5132_v46 }
  0x5d   : > { %1785 = vmatpush.bf16.msrb.mxu1 %v5140_v47 }
  0x5e   : > { %1846 = vmatpush.bf16.msrb.mxu2 %v5148_v48 }
  0x5f   : > { %1907 = vmatpush.bf16.msrb.mxu3 %v5156_v49 }
  0x60   : > { %1725 = vmatpush.bf16.msrb.mxu0 %v5131_v50  ;;  %s889_s0 = scalar_lea.vmem %s6893_s28, %s6850_s8  ;;  %s6735_s28 = sand.u32 1, %s5557_s3  }
  0x61   : > { %1786 = vmatpush.bf16.msrb.mxu1 %v5139_v51  ;;  %s6902_s8 = sld [smem:[#allocation31_spill]]  ;;  %s3914_s5 = scalar_lea.sflag [#allocation3], %s6735_s28 }
  0x62   : > { %1847 = vmatpush.bf16.msrb.mxu2 %v5147_v52  ;;  %v5402_v52 = vld [vmem:[%s6890_s25] ss:$0 sm:$0xff] }
  0x63   : > { %1908 = vmatpush.bf16.msrb.mxu3 %v5155_v53  ;;  %v5407_v53 = vld [vmem:[%s6888_s2 + $0x2] ss:$0 sm:$0xff] }
  0x64   : > { %1726 = vmatpush.bf16.msrb.mxu0 %v5130_v54  ;;  %v5408_v54 = vld [vmem:[%s6888_s2 + $0x3] ss:$0 sm:$0xff] }
  0x65   : > { %1787 = vmatpush.bf16.msrb.mxu1 %v5138_v55 }
  0x66   : > { %1848 = vmatpush.bf16.msrb.mxu2 %v5146_v56 }
  0x67   : > { %1909 = vmatpush.bf16.msrb.mxu3 %v5154_v57 }
  0x68   : > { %1727 = vmatpush.bf16.msrb.mxu0 %v5129_v58 }
  0x69   : > { %1788 = vmatpush.bf16.msrb.mxu1 %v5137_v59 }
  0x6a   : > { %1849 = vmatpush.bf16.msrb.mxu2 %v5145_v60 }
  0x6b   : > { %1910 = vmatpush.bf16.msrb.mxu3 %v5153_v61 }
  0x6c   : > { %1728 = vmatpush.bf16.msrb.mxu0 %v5128_v62 }
  0x6d   : > { %1789 = vmatpush.bf16.msrb.mxu1 %v5136_v63 }
  0x6e   : > { %1850 = vmatpush.bf16.msrb.mxu2 %v5144_v0 }
  0x6f   : > { %1911 = vmatpush.bf16.msrb.mxu3 %v5152_v1  ;;  %1729 = vmatmul.bf16.vlgmr.msrb.gmra.mxu0 %v5890_v37  ;;  %v5401_v1 = vld [vmem:[%s6890_s25 + $0x2] ss:$0 sm:$0xff] }
  0x70   : > { %1981 = vmatpush.bf16.msra.mxu0 %v5167_v3  ;;  %1790 = vmatmul.bf16.vlgmr.msrb.gmra.mxu1 %v5890_v37  ;;  %v5404_v3 = vld [vmem:[%s6890_s25 + $0x3] ss:$0 sm:$0xff] }
  0x71   : > { %1851 = vmatmul.bf16.vlgmr.msrb.gmra.mxu2 %v5890_v37  ;;  %2042 = vmatpush.bf16.msra.mxu1 %v5175_v4 }
  0x72   : > { %2103 = vmatpush.bf16.msra.mxu2 %v5183_v2  ;;  %1912 = vmatmul.bf16.vlgmr.msrb.gmra.mxu3 %v5890_v37 }
  0x73   : > { %2164 = vmatpush.bf16.msra.mxu3 %v5191_v5 }
  0x74   : > { %1982 = vmatpush.bf16.msra.mxu0 %v5166_v7 }
  0x75   : > { %2043 = vmatpush.bf16.msra.mxu1 %v5174_v8 }
  0x76   : > { %2104 = vmatpush.bf16.msra.mxu2 %v5182_v6 }
  0x77   : > { %2165 = vmatpush.bf16.msra.mxu3 %v5190_v9 }
  0x78   : > { %1983 = vmatpush.bf16.msra.mxu0 %v5165_v11 }
  0x79   : > { %2044 = vmatpush.bf16.msra.mxu1 %v5173_v12 }
  0x7a   : > { %2105 = vmatpush.bf16.msra.mxu2 %v5181_v10 }
  0x7b   : > { %2166 = vmatpush.bf16.msra.mxu3 %v5189_v13 }
  0x7c   : > { %1984 = vmatpush.bf16.msra.mxu0 %v5164_v15  ;;  %v5409_v15 = vld [vmem:[%s6891_s7] ss:$0 sm:$0xff] }
  0x7d   : > { %2045 = vmatpush.bf16.msra.mxu1 %v5172_v16  ;;  %v5410_v16 = vld [vmem:[%s6892_s10 + $0x1] ss:$0 sm:$0xff] }
  0x7e   : > { %2106 = vmatpush.bf16.msra.mxu2 %v5180_v14 }
  0x7f   : > { %2167 = vmatpush.bf16.msra.mxu3 %v5188_v21  ;;  %v5411_v21 = vld [vmem:[%s6892_s10 + $0x2] ss:$0 sm:$0xff] }
  0x80   : > { %1985 = vmatpush.bf16.msra.mxu0 %v5163_v18 }
  0x81   : > { %2046 = vmatpush.bf16.msra.mxu1 %v5171_v19 }
  0x82   : > { %2107 = vmatpush.bf16.msra.mxu2 %v5179_v17 }
  0x83   : > { %2168 = vmatpush.bf16.msra.mxu3 %v5187_v25 }
  0x84   : > { %1986 = vmatpush.bf16.msra.mxu0 %v5162_v22 }
  0x85   : > { %2047 = vmatpush.bf16.msra.mxu1 %v5170_v23 }
  0x86   : > { %2108 = vmatpush.bf16.msra.mxu2 %v5178_v20 }
  0x87   : > { %2169 = vmatpush.bf16.msra.mxu3 %v5186_v29 }
  0x88   : > { %1987 = vmatpush.bf16.msra.mxu0 %v5161_v26 }
  0x89   : > { %2048 = vmatpush.bf16.msra.mxu1 %v5169_v27 }
  0x8a   : > { %2109 = vmatpush.bf16.msra.mxu2 %v5177_v24 }
  0x8b   : > { %2170 = vmatpush.bf16.msra.mxu3 %v5185_v32  ;;  %v5412_v32 = vld [vmem:[%s6892_s10 + $0x3] ss:$0 sm:$0xff]  ;;  %s6900_s10 = sld [smem:[#allocation20_spill]] }
  0x8c   : > { %1988 = vmatpush.bf16.msra.mxu0 %v5160_v30 }
  0x8d   : > { %2049 = vmatpush.bf16.msra.mxu1 %v5168_v31 }
  0x8e   : > { %2110 = vmatpush.bf16.msra.mxu2 %v5176_v28 }
  0x8f   : > { %1989 = vmatmul.bf16.vlgmr.msra.gmra.mxu0 %v5890_v37  ;;  %2171 = vmatpush.bf16.msra.mxu3 %v5184_v33 }
  0x90   : > { %2050 = vmatmul.bf16.vlgmr.msra.gmra.mxu1 %v5890_v37 }
  0x91   : > { %2111 = vmatmul.bf16.vlgmr.msra.gmra.mxu2 %v5890_v37 }
  0x92   : > { %2172 = vmatmul.bf16.vlgmr.msra.gmra.mxu3 %v5890_v37  ;;  %v5403_v37 = vld [vmem:[%s6889_s4 + $0x1] ss:$0 sm:$0xff]  ;;  %s6898_s4 = sld [smem:[#allocation18_spill]] }
  0x98   : > { %s882_s6 = scalar_lea.vmem %s6898_s4, %s5850_s30  ;;  %s896_s4 = scalar_lea.vmem %s6900_s10, %s6899_s24 }
  0x99   : > { %s4102_s30 = sshll.u32 %s6735_s28, 3 }
  0x9a   : > { %s868_s9 = scalar_lea.vmem [#allocation2], %s4102_s30 }
  0x9b   : > { %s3931_s7 = sshll.u32 %s868_s9, 4  ;;  %s3932_s7 = int_to_ptr.vmem [resolvable:$true] %s3931_s7 }
  0xcc   : > { %v1470_v34 = vpop.f32.mrf.mxu0 }
  0xcd   : > { %v1531_v35 = vpop.f32.mrf.mxu1  ;;  %v1471_v60 = vadd.f32 %v5402_v52, %v1470_v34 }
  0xce   : > { %v1532_v57 = vadd.f32 %v5403_v37, %v1531_v35 }
  0xcf   : > { %v1657_v6 = vpack.c.bf16 %v1471_v60, %v1471_v60 }
  0xd0   : > { %v1658_v2 = vpack.c.bf16 %v1532_v57, %v1532_v57 }
  0xd4   : > { %v1592_v38 = vpop.f32.mrf.mxu2  ;;  %v1472_v40 = vpop.f32.mrf.mxu0 }
  0xd5   : > { %v1653_v39 = vpop.f32.mrf.mxu3  ;;  %v1533_v41 = vpop.f32.mrf.mxu1  ;;  %v1593_v9 = vadd.f32 %v5401_v1, %v1592_v38 }
  0xd6   : > { %v1654_v10 = vadd.f32 %v5404_v3, %v1653_v39  ;;  %v1399_v41 = vld [vmem:[%s889_s0] sm:$0xf]  ;;  %s6738_s0 = scalar_lea.vmem [#allocation4], %s6735_s28 }
  0xd7   : > { %v1659_v13 = vpack.c.bf16 %v1593_v9, %v1593_v9 }
  0xd8   : > { %v1660_v14 = vpack.c.bf16 %v1654_v10, %v1654_v10 }
  0xdc   : > { %v1594_v42 = vpop.f32.mrf.mxu2 }
  0xdd   : > { %v1655_v43 = vpop.f32.mrf.mxu3  ;;  %v2181_v42 = vunpack.c.l.bf16 %v1399_v41 }
  0xec   : > { %v1730_v46 = vpop.f32.mrf.mxu0 }
  0xed   : > { %v1791_v47 = vpop.f32.mrf.mxu1  ;;  %v1731_v48 = vadd.f32 %v5405_v44, %v1730_v46 }
  0xee   : > { %v1792_v49 = vadd.f32 %v5406_v45, %v1791_v47 }
  0xef   : > { %v1917_v50 = vpack.c.bf16 %v1731_v48, %v1731_v48 }
  0xf0   : > { %v1918_v51 = vpack.c.bf16 %v1792_v49, %v1792_v49 }
  0xf1   : > { %v2187_v55 = vsel %vm2182_vm0, %v1917_v50, 0 }
  0xf2   : > { %v2206_v56 = vsel %vm2182_vm0, %v1918_v51, 0  ;;  %2196 = vmatpush.bf16.xpose.msrb.mxu0 %v2187_v55 }
  0xf3   : > { %2215 = vmatpush.bf16.xpose.msrb.mxu1 %v2206_v56 }
  0xf4   : > { %v1852_v58 = vpop.f32.mrf.mxu2  ;;  %v1732_v63 = vpop.f32.mrf.mxu0 }
  0xf5   : > { %v1913_v59 = vpop.f32.mrf.mxu3  ;;  %v1853_v61 = vadd.f32 %v5407_v53, %v1852_v58  ;;  %v1793_v0 = vpop.f32.mrf.mxu1 }
  0xf6   : > { %v1914_v62 = vadd.f32 %v5408_v54, %v1913_v59 }
  0xf7   : > { %v1919_v4 = vpack.c.bf16 %v1853_v61, %v1853_v61 }
  0xf8   : > { %v1920_v5 = vpack.c.bf16 %v1914_v62, %v1914_v62 }
  0xf9   : > { %v2225_v7 = vsel %vm2182_vm0, %v1919_v4, 0  ;;  %4492 = vmatmul.msk.bf16.vlgmr.msrb.gmra.mxu0 %vm2182_vm0, %v1657_v6 }
  0xfa   : > { %v2244_v8 = vsel %vm2182_vm0, %v1920_v5, 0  ;;  %2234 = vmatpush.bf16.xpose.msrb.mxu2 %v2225_v7  ;;  %4493 = vmatmul.msk.bf16.vlgmr.msrb.gmra.mxu1 %vm2182_vm0, %v1658_v2 }
  0xfb   : > { %2253 = vmatpush.bf16.xpose.msrb.mxu3 %v2244_v8 }
  0xfc   : > { %v1854_v11 = vpop.f32.mrf.mxu2 }
  0xfd   : > { %v1915_v12 = vpop.f32.mrf.mxu3 }
 0x101   : > { %4494 = vmatmul.msk.bf16.vlgmr.msrb.gmra.mxu2 %vm2182_vm0, %v1659_v13 }
 0x102   : > { %4495 = vmatmul.msk.bf16.vlgmr.msrb.gmra.mxu3 %vm2182_vm0, %v1660_v14 }
 0x10c   : > { %v1990_v17 = vpop.f32.mrf.mxu0 }
 0x10d   : > { %v2051_v18 = vpop.f32.mrf.mxu1  ;;  %v1991_v19 = vadd.f32 %v5409_v15, %v1990_v17  ;;  %v5193_v15 = vld [vmem:[%s6894_s11 + $0x8] sm:$0xff] }
 0x10e   : > { %v2052_v20 = vadd.f32 %v5410_v16, %v2051_v18 }
 0x10f   : > { %v2177_v22 = vpack.c.bf16 %v1991_v19, %v1991_v19 }
 0x110   : > { %v2178_v23 = vpack.c.bf16 %v2052_v20, %v2052_v20 }
 0x111   : > { %v2313_v25 = vsel %vm2311_vm1, %v2177_v22, 0 }
 0x112   : > { %v2332_v26 = vsel %vm2311_vm1, %v2178_v23, 0  ;;  %2322 = vmatpush.bf16.msra.mxu0 %v2313_v25 }
 0x113   : > { %2341 = vmatpush.bf16.msra.mxu1 %v2332_v26 }
 0x114   : > { %v2112_v24 = vpop.f32.mrf.mxu2  ;;  %v1992_v29 = vpop.f32.mrf.mxu0 }
 0x115   : > { %v2113_v27 = vadd.f32 %v5411_v21, %v2112_v24  ;;  %v2053_v30 = vpop.f32.mrf.mxu1  ;;  %v2173_v34 = vpop.f32.mrf.mxu3 }
 0x116   : > { %v2174_v35 = vadd.f32 %v5412_v32, %v2173_v34  ;;  %2410 = vmatpush.bf16.msrb.mxu0 %v5193_v15  ;;  %v5195_v32 = vld [vmem:[%s6894_s11 + $0x18] sm:$0xff]  ;;  %v5197_v34 = vld [vmem:[%s6894_s11 + $0x28] sm:$0xff] }
 0x117   : > { %v2179_v28 = vpack.c.bf16 %v2113_v27, %v2113_v27  ;;  %2438 = vmatpush.bf16.msrb.mxu1 %v5195_v32  ;;  %v5217_v15 = vld [vmem:[%s6896_s13 + $0x88] sm:$0xff] }
 0x118   : > { %v2180_v38 = vpack.c.bf16 %v2174_v35, %v2174_v35  ;;  %v5196_v35 = vld [vmem:[%s6894_s11 + $0x20] sm:$0xff]  ;;  %v5253_v32 = vld [vmem:[%s6819_s15 + $0xa8] sm:$0xff] }
 0x119   : > { %v2351_v31 = vsel %vm2311_vm1, %v2179_v28, 0 }
 0x11a   : > { %2360 = vmatpush.bf16.msra.mxu2 %v2351_v31  ;;  %v2370_v39 = vsel %vm2311_vm1, %v2180_v38, 0  ;;  %v5192_v31 = vld [vmem:[%s6894_s11] sm:$0xff]  ;;  %v5199_v38 = vld [vmem:[%s6894_s11 + $0x38] sm:$0xff] }
 0x11b   : > { %2379 = vmatpush.bf16.msra.mxu3 %v2370_v39  ;;  %2411 = vmatpush.bf16.msrb.mxu0 %v5192_v31  ;;  %v5198_v39 = vld [vmem:[%s6894_s11 + $0x30] sm:$0xff]  ;;  %v5245_v31 = vld [vmem:[%s6819_s15 + $0x68] sm:$0xff] }
 0x11c   : > { %v2114_v33 = vpop.f32.mrf.mxu2 }
 0x11d   : > { %v2175_v40 = vpop.f32.mrf.mxu3  ;;  %v5194_v33 = vld [vmem:[%s6894_s11 + $0x10] sm:$0xff] }
 0x11e   : > { %2439 = vmatpush.bf16.msrb.mxu1 %v5194_v33  ;;  %2466 = vmatpush.bf16.msrb.mxu2 %v5197_v34  ;;  %v5261_v33 = vld [vmem:[%s6819_s15 + $0xe8] sm:$0xff]  ;;  %v5236_v34 = vld [vmem:[%s6819_s15 + $0x20] sm:$0xff] }
 0x11f   : > { %2494 = vmatpush.bf16.msrb.mxu3 %v5199_v38  ;;  %v5252_v38 = vld [vmem:[%s6819_s15 + $0xa0] sm:$0xff] }
 0x122   : > { %2467 = vmatpush.bf16.msrb.mxu2 %v5196_v35  ;;  %v5244_v35 = vld [vmem:[%s6819_s15 + $0x60] sm:$0xff] }
 0x123   : > { %2495 = vmatpush.bf16.msrb.mxu3 %v5198_v39  ;;  %v5260_v39 = vld [vmem:[%s6819_s15 + $0xe0] sm:$0xff] }
 0x176   : > { %v2198_v43 = vpop.f32.mrf.mxu0 }
 0x177   : > { %v2217_v44 = vpop.f32.mrf.mxu1  ;;  %v2199_v45 = vadd.f32 %v2198_v43, %v2181_v42  ;;  %v5207_v43 = vld [vmem:[%s6896_s13 + $0x38] sm:$0xff] }
 0x178   : > { %v2218_v47 = vadd.f32 %v2217_v44, %v2181_v42  ;;  %v5215_v44 = vld [vmem:[%s6896_s13 + $0x78] sm:$0xff] }
 0x179   : > { %v2260_v46 = vsel %vm2259_vm2, %v2199_v45, -inf }
 0x17a   : > { %2261 = vmax.xlane.f32.xlu1 %v2260_v46  ;;  %v2263_v37 = vsel %vm2259_vm2, %v2218_v47, -inf  ;;  %v5223_v46 = vld [vmem:[%s6896_s13 + $0xb8] sm:$0xff] }
 0x17e   : > { %v2200_v48 = vpop.f32.mrf.mxu0 }
 0x17f   : > { %v2219_v49 = vpop.f32.mrf.mxu1 }
 0x182   : > { %2264 = vmax.xlane.f32.xlu1 %v2263_v37 }
 0x184   : > { %v2236_v50 = vpop.f32.mrf.mxu2 }
 0x185   : > { %v2255_v51 = vpop.f32.mrf.mxu3  ;;  %v2237_v52 = vadd.f32 %v2236_v50, %v2181_v42 }
 0x186   : > { %v2256_v54 = vadd.f32 %v2255_v51, %v2181_v42  ;;  %v1395_v42 = vld [vmem:[%s6178_s1] sm:$0xff] }
 0x187   : > { %v2266_v53 = vsel %vm2259_vm2, %v2237_v52, -inf }
 0x188   : > { %2267 = vmax.xlane.f32.xlu0 %v2266_v53  ;;  %v2269_v57 = vsel %vm2259_vm2, %v2256_v54, -inf }
 0x18c   : > { %v2238_v55 = vpop.f32.mrf.mxu2 }
 0x18d   : > { %v2257_v56 = vpop.f32.mrf.mxu3 }
 0x190   : > { %2270 = vmax.xlane.f32.xlu0 %v2269_v57  ;;  %v5206_v57 = vld [vmem:[%s6896_s13 + $0x30] sm:$0xff] }
 0x1ed   : > { %v2262_v58 = vpop.xlane.xlu1 %2261 }
 0x1ee   : > { %v2272_v59 = vsub.f32 %v2199_v45, %v2262_v58  ;;  %v5575_v45 = vmov 0   ;;  %v5214_v58 = vld [vmem:[%s6896_s13 + $0x70] sm:$0xff] }
 0x1ef   : > { %5398 = vset.pattern.permute.xlu2 %v5575_v45  ;;  %5399 = vset.pattern.permute.xlu1 %v5575_v45 }
 0x1f0   : > { %v2276_v60 = vmul.f32 1.442695, %v2272_v59  ;;  %5400 = vset.pattern.permute.xlu0 %v5575_v45  ;;  %v5222_v59 = vld [vmem:[%s6896_s13 + $0xb0] sm:$0xff]  ;;  %v5259_v45 = vld [vmem:[%s6819_s15 + $0xd8] sm:$0xff] }
 0x1f2   : > { %5428 = vpow2.f32 %v2276_v60  ;;  %v5230_v60 = vld [vmem:[%s6896_s13 + $0xf0] sm:$0xff] }
 0x1f5   : > { %v2265_v61 = vpop.xlane.xlu1 %2264 }
 0x1f6   : > { %v2273_v62 = vsub.f32 %v2218_v47, %v2265_v61  ;;  %v5231_v47 = vld [vmem:[%s6896_s13 + $0xf8] sm:$0xff]  ;;  %v5205_v61 = vld [vmem:[%s6896_s13 + $0x28] sm:$0xff] }
 0x1f8   : > { %v5429_v63 = vpop.eup %5428  ;;  %v2278_v0 = vmul.f32 1.442695, %v2273_v62  ;;  %v5213_v62 = vld [vmem:[%s6896_s13 + $0x68] sm:$0xff] }
 0x1f9   : > { %v2284_v2 = vsel %vm2259_vm2, %v5429_v63, 0.0 }
 0x1fa   : > { %5430 = vpow2.f32 %v2278_v0  ;;  %2285 = vadd.xlane.f32.xlu0 %v2284_v2  ;;  %v5229_v0 = vld [vmem:[%s6896_s13 + $0xe8] sm:$0xff]  ;;  %v5212_v2 = vld [vmem:[%s6896_s13 + $0x60] sm:$0xff] }
 0x1fb   : > { %v2268_v1 = vpop.xlane.xlu0 %2267 }
 0x1fc   : > { %v2274_v3 = vsub.f32 %v2237_v52, %v2268_v1  ;;  %v5204_v1 = vld [vmem:[%s6896_s13 + $0x20] sm:$0xff] }
 0x1fe   : > { %v2280_v4 = vmul.f32 1.442695, %v2274_v3  ;;  %v5220_v3 = vld [vmem:[%s6896_s13 + $0xa0] sm:$0xff] }
 0x200   : > { %5432 = vpow2.f32 %v2280_v4  ;;  %v5431_v5 = vpop.eup %5430  ;;  %v5228_v4 = vld [vmem:[%s6896_s13 + $0xe0] sm:$0xff] }
 0x201   : > { %v2287_v7 = vsel %vm2259_vm2, %v5431_v5, 0.0 }
 0x202   : > { %2288 = vadd.xlane.f32.xlu1 %v2287_v7  ;;  %v5219_v7 = vld [vmem:[%s6896_s13 + $0x98] sm:$0xff] }
 0x203   : > { %v2271_v6 = vpop.xlane.xlu0 %2270 }
 0x204   : > { %v2275_v8 = vsub.f32 %v2256_v54, %v2271_v6  ;;  %v5211_v6 = vld [vmem:[%s6896_s13 + $0x58] sm:$0xff] }
 0x206   : > { %v5433_v9 = vpop.eup %5432  ;;  %v2282_v10 = vmul.f32 1.442695, %v2275_v8  ;;  %v5227_v8 = vld [vmem:[%s6896_s13 + $0xd8] sm:$0xff] }
 0x207   : > { %v2290_v11 = vsel %vm2259_vm2, %v5433_v9, 0.0 }
 0x208   : > { %5434 = vpow2.f32 %v2282_v10  ;;  %2291 = vadd.xlane.f32.xlu2 %v2290_v11  ;;  %v5210_v10 = vld [vmem:[%s6896_s13 + $0x50] sm:$0xff] }
 0x209   : > { %v5218_v11 = vld [vmem:[%s6896_s13 + $0x90] sm:$0xff] }
 0x20e   : > { %v5435_v12 = vpop.eup %5434 }
 0x20f   : > { %v2293_v13 = vsel %vm2259_vm2, %v5435_v12, 0.0 }
 0x210   : > { %2294 = vadd.xlane.f32.xlu2 %v2293_v13  ;;  %v5201_v13 = vld [vmem:[%s6896_s13 + $0x8] sm:$0xff] }
 0x228   : > { %2511 = vperm.xlu2 %5398, %v1395_v42   ;;  %v5235_v42 = vld [vmem:[%s6819_s15 + $0x18] sm:$0xff] }
 0x26d   : > { %v2286_v14 = vpop.xlane.xlu0 %2285 }
 0x26e   : > { %5436 = vrcp.f32 %v2286_v14  ;;  %v5209_v14 = vld [vmem:[%s6896_s13 + $0x48] sm:$0xff] }
 0x274   : > { %v5437_v16 = vpop.eup %5436 }
 0x275   : > { %v2300_v17 = vmul.f32 %v5437_v16, %v5429_v63  ;;  %v2289_v18 = vpop.xlane.xlu1 %2288  ;;  %v5221_v63 = vld [vmem:[%s6896_s13 + $0xa8] sm:$0xff] }
 0x276   : > { %5438 = vrcp.f32 %v2289_v18  ;;  %v5225_v16 = vld [vmem:[%s6896_s13 + $0xc8] sm:$0xff]  ;;  %v5208_v18 = vld [vmem:[%s6896_s13 + $0x40] sm:$0xff] }
 0x277   : > { %v2304_v19 = vpack.c.bf16 %v2300_v17, %v2300_v17  ;;  %v5200_v17 = vld [vmem:[%s6896_s13] sm:$0xff] }
 0x279   : > { %4496 = vmatmul.msk.bf16.vlgmr.msra.gmra.mxu0 %vm2259_vm2, %v2304_v19  ;;  %v5216_v19 = vld [vmem:[%s6896_s13 + $0x80] sm:$0xff] }
 0x27a   : > { %2576 = vmatpush.bf16.msra.mxu0 %v5207_v43  ;;  %v5243_v43 = vld [vmem:[%s6819_s15 + $0x58] sm:$0xff] }
 0x27b   : > { %v2292_v20 = vpop.xlane.xlu2 %2291 }
 0x27c   : > { %5440 = vrcp.f32 %v2292_v20  ;;  %v5439_v21 = vpop.eup %5438  ;;  %v5224_v20 = vld [vmem:[%s6896_s13 + $0xc0] sm:$0xff] }
 0x27d   : > { %v2301_v22 = vmul.f32 %v5439_v21, %v5431_v5  ;;  %v5203_v5 = vld [vmem:[%s6896_s13 + $0x18] sm:$0xff] }
 0x27e   : > { %2577 = vmatpush.bf16.msra.mxu0 %v5206_v57  ;;  %v5239_v21 = vld [vmem:[%s6819_s15 + $0x38] sm:$0xff]  ;;  %v5256_v57 = vld [vmem:[%s6819_s15 + $0xc0] sm:$0xff] }
 0x27f   : > { %v2305_v23 = vpack.c.bf16 %v2301_v22, %v2301_v22  ;;  %v5247_v22 = vld [vmem:[%s6819_s15 + $0x78] sm:$0xff] }
 0x281   : > { %4497 = vmatmul.msk.bf16.vlgmr.msra.gmra.mxu1 %vm2259_vm2, %v2305_v23  ;;  %v5255_v23 = vld [vmem:[%s6819_s15 + $0xb8] sm:$0xff] }
 0x282   : > { %v5441_v24 = vpop.eup %5440  ;;  %2637 = vmatpush.bf16.msra.mxu1 %v5215_v44  ;;  %2578 = vmatpush.bf16.msra.mxu0 %v5205_v61  ;;  %v5251_v44 = vld [vmem:[%s6819_s15 + $0x98] sm:$0xff]  ;;  %v5413_v61 = vld [vmem:[%s6897_s12] ss:$0 sm:$0xff] }
 0x283   : > { %v2302_v25 = vmul.f32 %v5441_v24, %v5433_v9  ;;  %v2295_v26 = vpop.xlane.xlu2 %2294  ;;  %v5202_v9 = vld [vmem:[%s6896_s13 + $0x10] sm:$0xff]  ;;  %v5263_v24 = vld [vmem:[%s6819_s15 + $0xf8] sm:$0xff] }
 0x284   : > { %5442 = vrcp.f32 %v2295_v26  ;;  %v5246_v26 = vld [vmem:[%s6819_s15 + $0x70] sm:$0xff] }
 0x285   : > { %v2306_v27 = vpack.c.bf16 %v2302_v25, %v2302_v25  ;;  %v5238_v25 = vld [vmem:[%s6819_s15 + $0x30] sm:$0xff] }
 0x286   : > { %2638 = vmatpush.bf16.msra.mxu1 %v5214_v58  ;;  %2579 = vmatpush.bf16.msra.mxu0 %v5204_v1 }
 0x287   : > { %4498 = vmatmul.msk.bf16.vlgmr.msra.gmra.mxu2 %vm2259_vm2, %v2306_v27  ;;  %v5254_v27 = vld [vmem:[%s6819_s15 + $0xb0] sm:$0xff] }
 0x288   : > { %2698 = vmatpush.bf16.msra.mxu2 %v5223_v46  ;;  %v5234_v46 = vld [vmem:[%s6819_s15 + $0x10] sm:$0xff] }
 0x28a   : > { %v5443_v28 = vpop.eup %5442  ;;  %2639 = vmatpush.bf16.msra.mxu1 %v5213_v62  ;;  %2580 = vmatpush.bf16.msra.mxu0 %v5203_v5 }
 0x28b   : > { %v2303_v29 = vmul.f32 %v5443_v28, %v5435_v12  ;;  %v5226_v12 = vld [vmem:[%s6896_s13 + $0xd0] sm:$0xff] }
 0x28c   : > { %2699 = vmatpush.bf16.msra.mxu2 %v5222_v59  ;;  %v5262_v28 = vld [vmem:[%s6819_s15 + $0xf0] sm:$0xff] }
 0x28d   : > { %v2307_v30 = vpack.c.bf16 %v2303_v29, %v2303_v29 }
 0x28e   : > { %2640 = vmatpush.bf16.msra.mxu1 %v5212_v2  ;;  %2581 = vmatpush.bf16.msra.mxu0 %v5202_v9  ;;  %v6380_v2 = vpop.permute.xlu2 %2511  ;;  %v5295_v9 = vld [vmem:[%s6821_s17 + $0xf8] sm:$0xff] }
 0x28f   : > { %4499 = vmatmul.msk.bf16.vlgmr.msra.gmra.mxu3 %vm2259_vm2, %v2307_v30  ;;  %v5237_v30 = vld [vmem:[%s6819_s15 + $0x28] sm:$0xff] }
 0x290   : > { %2759 = vmatpush.bf16.msra.mxu3 %v5231_v47  ;;  %2700 = vmatpush.bf16.msra.mxu2 %v5221_v63  ;;  %v5242_v47 = vld [vmem:[%s6819_s15 + $0x50] sm:$0xff] }
 0x292   : > { %2641 = vmatpush.bf16.msra.mxu1 %v5211_v6  ;;  %2582 = vmatpush.bf16.msra.mxu0 %v5201_v13  ;;  %v5294_v13 = vld [vmem:[%s6821_s17 + $0xf0] sm:$0xff] }
 0x294   : > { %2760 = vmatpush.bf16.msra.mxu3 %v5230_v60  ;;  %2701 = vmatpush.bf16.msra.mxu2 %v5220_v3 }
 0x296   : > { %2642 = vmatpush.bf16.msra.mxu1 %v5210_v10  ;;  %2583 = vmatpush.bf16.msra.mxu0 %v5200_v17  ;;  %v5270_v10 = vld [vmem:[%s6821_s17 + $0x30] sm:$0xff]  ;;  %v5293_v17 = vld [vmem:[%s6821_s17 + $0xe8] sm:$0xff] }
 0x298   : > { %2761 = vmatpush.bf16.msra.mxu3 %v5229_v0  ;;  %2702 = vmatpush.bf16.msra.mxu2 %v5219_v7  ;;  %v5271_v7 = vld [vmem:[%s6821_s17 + $0x38] sm:$0xff] }
 0x29a   : > { %2643 = vmatpush.bf16.msra.mxu1 %v5209_v14  ;;  %v5269_v14 = vld [vmem:[%s6821_s17 + $0x28] sm:$0xff] }
 0x29c   : > { %2762 = vmatpush.bf16.msra.mxu3 %v5228_v4  ;;  %2703 = vmatpush.bf16.msra.mxu2 %v5218_v11  ;;  %v5278_v11 = vld [vmem:[%s6821_s17 + $0x70] sm:$0xff] }
 0x29e   : > { %2644 = vmatpush.bf16.msra.mxu1 %v5208_v18  ;;  %v1397_v18 = vld [vmem:[%s882_s6] sm:$0xff]  ;;  %s6901_s6 = sld [smem:[#allocation10_spill]] }
 0x2a0   : > { %2763 = vmatpush.bf16.msra.mxu3 %v5227_v8  ;;  %2704 = vmatpush.bf16.msra.mxu2 %v5217_v15  ;;  %v5279_v8 = vld [vmem:[%s6821_s17 + $0x78] sm:$0xff]  ;;  %v5277_v15 = vld [vmem:[%s6821_s17 + $0x68] sm:$0xff] }
 0x2a4   : > { %2764 = vmatpush.bf16.msra.mxu3 %v5226_v12  ;;  %2705 = vmatpush.bf16.msra.mxu2 %v5216_v19  ;;  %v5286_v12 = vld [vmem:[%s6821_s17 + $0xb0] sm:$0xff]  ;;  %v5268_v19 = vld [vmem:[%s6821_s17 + $0x20] sm:$0xff]  ;;  %s5093_s24 = sshll.u32 %s6901_s6, 3 }
 0x2a8   : > { %2765 = vmatpush.bf16.msra.mxu3 %v5225_v16  ;;  %v5285_v16 = vld [vmem:[%s6821_s17 + $0xa8] sm:$0xff] }
 0x2ac   : > { %2766 = vmatpush.bf16.msra.mxu3 %v5224_v20  ;;  %v5276_v20 = vld [vmem:[%s6821_s17 + $0x60] sm:$0xff] }
 0x2f6   : > { %v2324_v40 = vpop.f32.mrf.mxu0 }
 0x2f7   : > { %v2385_v41 = vpack.c.bf16 %v2324_v40, %v2324_v40 }
 0x2f9   : > { %4508 = vmatmul.msk.bf16.vlgmr.msrb.gmra.mxu0 %vm2182_vm0, %v2385_v41 }
 0x2fa   : > { %2836 = vmatpush.bf16.msrb.mxu0 %v5239_v21  ;;  %v1398_v21 = vpack.c.bf16 %v1397_v18, %v1397_v18 }
 0x2fe   : > { %v2326_v48 = vpop.f32.mrf.mxu0  ;;  %v2343_v49 = vpop.f32.mrf.mxu1  ;;  %2837 = vmatpush.bf16.msrb.mxu0 %v5238_v25  ;;  %v5292_v25 = vld [vmem:[%s6821_s17 + $0xe0] sm:$0xff] }
 0x2ff   : > { %v2386_v37 = vpack.c.bf16 %v2343_v49, %v2343_v49  ;;  %v5250_v48 = vld [vmem:[%s6819_s15 + $0x90] sm:$0xff] }
 0x300   : > { %v5258_v49 = vld [vmem:[%s6819_s15 + $0xd0] sm:$0xff] }
 0x301   : > { %4517 = vmatmul.msk.bf16.vlgmr.msrb.gmra.mxu1 %vm2182_vm0, %v2386_v37 }
 0x302   : > { %2897 = vmatpush.bf16.msrb.mxu1 %v5247_v22  ;;  %2838 = vmatpush.bf16.msrb.mxu0 %v5237_v30  ;;  %v5267_v22 = vld [vmem:[%s6821_s17 + $0x18] sm:$0xff]  ;;  %v5274_v30 = vld [vmem:[%s6821_s17 + $0x50] sm:$0xff] }
 0x306   : > { %v2345_v50 = vpop.f32.mrf.mxu1  ;;  %2898 = vmatpush.bf16.msrb.mxu1 %v5246_v26  ;;  %2839 = vmatpush.bf16.msrb.mxu0 %v5236_v34  ;;  %v5283_v26 = vld [vmem:[%s6821_s17 + $0x98] sm:$0xff]  ;;  %v5273_v34 = vld [vmem:[%s6821_s17 + $0x48] sm:$0xff] }
 0x307   : > { %v5233_v50 = vld [vmem:[%s6819_s15 + $0x8] sm:$0xff] }
 0x30a   : > { %v2362_v51 = vpop.f32.mrf.mxu2  ;;  %2899 = vmatpush.bf16.msrb.mxu1 %v5245_v31  ;;  %2840 = vmatpush.bf16.msrb.mxu0 %v5235_v42  ;;  %v5290_v31 = vld [vmem:[%s6821_s17 + $0xd0] sm:$0xff] }
 0x30b   : > { %v2387_v52 = vpack.c.bf16 %v2362_v51, %v2362_v51  ;;  %v5241_v51 = vld [vmem:[%s6819_s15 + $0x48] sm:$0xff] }
 0x30d   : > { %4526 = vmatmul.msk.bf16.vlgmr.msrb.gmra.mxu2 %vm2182_vm0, %v2387_v52  ;;  %v5249_v52 = vld [vmem:[%s6819_s15 + $0x88] sm:$0xff] }
 0x30e   : > { %2958 = vmatpush.bf16.msrb.mxu2 %v5255_v23  ;;  %2900 = vmatpush.bf16.msrb.mxu1 %v5244_v35  ;;  %v5275_v23 = vld [vmem:[%s6821_s17 + $0x58] sm:$0xff]  ;;  %v5289_v35 = vld [vmem:[%s6821_s17 + $0xc8] sm:$0xff] }
 0x30f   : > { %2841 = vmatpush.bf16.msrb.mxu0 %v5234_v46 }
 0x312   : > { %v2364_v53 = vpop.f32.mrf.mxu2  ;;  %v2381_v54 = vpop.f32.mrf.mxu3  ;;  %2959 = vmatpush.bf16.msrb.mxu2 %v5254_v27  ;;  %2901 = vmatpush.bf16.msrb.mxu1 %v5243_v43  ;;  %v5291_v27 = vld [vmem:[%s6821_s17 + $0xd8] sm:$0xff] }
 0x313   : > { %v2388_v55 = vpack.c.bf16 %v2381_v54, %v2381_v54  ;;  %v5257_v53 = vld [vmem:[%s6819_s15 + $0xc8] sm:$0xff]  ;;  %2842 = vmatpush.bf16.msrb.mxu0 %v5233_v50  ;;  %v5232_v54 = vld [vmem:[%s6819_s15] sm:$0xff] }
 0x315   : > { %4535 = vmatmul.msk.bf16.vlgmr.msrb.gmra.mxu3 %vm2182_vm0, %v2388_v55  ;;  %v5240_v55 = vld [vmem:[%s6819_s15 + $0x40] sm:$0xff] }
 0x316   : > { %3019 = vmatpush.bf16.msrb.mxu3 %v5263_v24  ;;  %2960 = vmatpush.bf16.msrb.mxu2 %v5253_v32  ;;  %v5284_v24 = vld [vmem:[%s6821_s17 + $0xa0] sm:$0xff]  ;;  %v5281_v32 = vld [vmem:[%s6821_s17 + $0x88] sm:$0xff] }
 0x317   : > { %2902 = vmatpush.bf16.msrb.mxu1 %v5242_v47  ;;  %2843 = vmatpush.bf16.msrb.mxu0 %v5232_v54 }
 0x31a   : > { %v2383_v56 = vpop.f32.mrf.mxu3  ;;  %3020 = vmatpush.bf16.msrb.mxu3 %v5262_v28  ;;  %2961 = vmatpush.bf16.msrb.mxu2 %v5252_v38  ;;  %v5282_v28 = vld [vmem:[%s6821_s17 + $0x90] sm:$0xff]  ;;  %v5280_v38 = vld [vmem:[%s6821_s17 + $0x80] sm:$0xff] }
 0x31b   : > { %2903 = vmatpush.bf16.msrb.mxu1 %v5241_v51  ;;  %v5248_v56 = vld [vmem:[%s6819_s15 + $0x80] sm:$0xff] }
 0x31e   : > { %3021 = vmatpush.bf16.msrb.mxu3 %v5261_v33  ;;  %2962 = vmatpush.bf16.msrb.mxu2 %v5251_v44  ;;  %v5265_v33 = vld [vmem:[%s6821_s17 + $0x8] sm:$0xff] }
 0x31f   : > { %2904 = vmatpush.bf16.msrb.mxu1 %v5240_v55  ;;  %v5414_v55 = vld [vmem:[%s6818_s14] ss:$0 sm:$0xff] }
 0x322   : > { %3022 = vmatpush.bf16.msrb.mxu3 %v5260_v39  ;;  %2963 = vmatpush.bf16.msrb.mxu2 %v5250_v48  ;;  %v5264_v39 = vld [vmem:[%s6821_s17] sm:$0xff] }
 0x323   : > { %v5418_v48 = vld [vmem:[%s6820_s16] ss:$0 sm:$0xff] }
 0x326   : > { %3023 = vmatpush.bf16.msrb.mxu3 %v5259_v45  ;;  %2964 = vmatpush.bf16.msrb.mxu2 %v5249_v52 }
 0x32a   : > { %3024 = vmatpush.bf16.msrb.mxu3 %v5258_v49  ;;  %2965 = vmatpush.bf16.msrb.mxu2 %v5248_v56  ;;  %v5419_v49 = vld [vmem:[%s6820_s16 + $0x1] ss:$0 sm:$0xff] }
 0x32e   : > { %3025 = vmatpush.bf16.msrb.mxu3 %v5257_v53 }
 0x332   : > { %3026 = vmatpush.bf16.msrb.mxu3 %v5256_v57 }
 0x376   : > { %v2413_v29 = vpop.f32.mrf.mxu0 }
 0x37e   : > { %v2415_v40 = vpop.f32.mrf.mxu0  ;;  %v2441_v41 = vpop.f32.mrf.mxu1 }
 0x37f   : > { %v2501_v59 = vadd.f32 %v2441_v41, %v2413_v29  ;;  %v5266_v29 = vld [vmem:[%s6821_s17 + $0x10] sm:$0xff]  ;;  %v5272_v40 = vld [vmem:[%s6821_s17 + $0x40] sm:$0xff] }
 0x380   : > { %v5288_v41 = vld [vmem:[%s6821_s17 + $0xc0] sm:$0xff] }
 0x386   : > { %v2443_v37 = vpop.f32.mrf.mxu1 }
 0x390   : > { %v2469_v58 = vpop.f32.mrf.mxu2 }
 0x391   : > { %v2502_v60 = vadd.f32 %v2501_v59, %v2469_v58  ;;  %v5415_v58 = vld [vmem:[%s6818_s14 + $0x1] ss:$0 sm:$0xff]  ;;  %v5420_v59 = vld [vmem:[%s6820_s16 + $0x2] ss:$0 sm:$0xff] }
 0x398   : > { %v2471_v62 = vpop.f32.mrf.mxu2  ;;  %v2497_v63 = vpop.f32.mrf.mxu3 }
 0x399   : > { %v2503_v0 = vadd.f32 %v2502_v60, %v2497_v63  ;;  %v5421_v60 = vld [vmem:[%s6820_s16 + $0x3] ss:$0 sm:$0xff] }
 0x39b   : > { %v2507_v1 = vadd.f32 %v5413_v61, %v2503_v0 }
 0x39d   : > { %v2508_v3 = vadd.f32 %v2507_v1, %v5886_v36  ;;  %v5287_v36 = vld [vmem:[%s6821_s17 + $0xb8] sm:$0xff] }
 0x39f   : > { %v6384_v4 = vmul.f32 %v6380_v2, %v2508_v3 }
 0x3a0   : > { %v2499_v5 = vpop.f32.mrf.mxu3 }
 0x3a1   : > { %v2515_v6 = vpack.c.bf16 %v6384_v4, %v6384_v4 }
 0x3a3   : > { %2584 = vmatmul.bf16.vlgmr.msra.gmra.mxu0 %v2515_v6  ;;  %2645 = vmatmul.bf16.vlgmr.msra.gmra.mxu1 %v2515_v6 }
 0x3a4   : > { %2706 = vmatmul.bf16.vlgmr.msra.gmra.mxu2 %v2515_v6  ;;  %2767 = vmatmul.bf16.vlgmr.msra.gmra.mxu3 %v2515_v6 }
 0x3a5   : > { %3096 = vmatpush.bf16.msra.mxu0 %v5271_v7  ;;  %3157 = vmatpush.bf16.msra.mxu1 %v5279_v8 }
 0x3a6   : > { %3218 = vmatpush.bf16.msra.mxu2 %v5287_v36  ;;  %3279 = vmatpush.bf16.msra.mxu3 %v5295_v9  ;;  %v5416_v36 = vld [vmem:[%s6818_s14 + $0x2] ss:$0 sm:$0xff]  ;;  %v5417_v9 = vld [vmem:[%s6818_s14 + $0x3] ss:$0 sm:$0xff] }
 0x3a9   : > { %3097 = vmatpush.bf16.msra.mxu0 %v5270_v10  ;;  %3158 = vmatpush.bf16.msra.mxu1 %v5278_v11 }
 0x3aa   : > { %3219 = vmatpush.bf16.msra.mxu2 %v5286_v12  ;;  %3280 = vmatpush.bf16.msra.mxu3 %v5294_v13 }
 0x3ad   : > { %3098 = vmatpush.bf16.msra.mxu0 %v5269_v14  ;;  %3159 = vmatpush.bf16.msra.mxu1 %v5277_v15 }
 0x3ae   : > { %3220 = vmatpush.bf16.msra.mxu2 %v5285_v16  ;;  %3281 = vmatpush.bf16.msra.mxu3 %v5293_v17 }
 0x3b1   : > { %3099 = vmatpush.bf16.msra.mxu0 %v5268_v19  ;;  %3160 = vmatpush.bf16.msra.mxu1 %v5276_v20 }
 0x3b2   : > { %3221 = vmatpush.bf16.msra.mxu2 %v5284_v24  ;;  %3282 = vmatpush.bf16.msra.mxu3 %v5292_v25 }
 0x3b3   : > { %2844 = vmatmul.bf16.vlgmr.msrb.gmra.mxu0 %v1398_v21  ;;  %2905 = vmatmul.bf16.vlgmr.msrb.gmra.mxu1 %v1398_v21 }
 0x3b4   : > { %2966 = vmatmul.bf16.vlgmr.msrb.gmra.mxu2 %v1398_v21  ;;  %3027 = vmatmul.bf16.vlgmr.msrb.gmra.mxu3 %v1398_v21 }
 0x3b5   : > { %3100 = vmatpush.bf16.msra.mxu0 %v5267_v22  ;;  %3161 = vmatpush.bf16.msra.mxu1 %v5275_v23  ;;  %v5422_v22 = vld [vmem:[%s6822_s18] ss:$0 sm:$0xff]  ;;  %v5423_v23 = vld [vmem:[%s6822_s18 + $0x1] ss:$0 sm:$0xff] }
 0x3b6   : > { %3222 = vmatpush.bf16.msra.mxu2 %v5283_v26  ;;  %3283 = vmatpush.bf16.msra.mxu3 %v5291_v27 }
 0x3b9   : > { %3101 = vmatpush.bf16.msra.mxu0 %v5266_v29  ;;  %3162 = vmatpush.bf16.msra.mxu1 %v5274_v30 }
 0x3ba   : > { %3223 = vmatpush.bf16.msra.mxu2 %v5282_v28  ;;  %3284 = vmatpush.bf16.msra.mxu3 %v5290_v31  ;;  %v5424_v28 = vld [vmem:[%s6822_s18 + $0x2] ss:$0 sm:$0xff] }
 0x3bd   : > { %3102 = vmatpush.bf16.msra.mxu0 %v5265_v33  ;;  %3163 = vmatpush.bf16.msra.mxu1 %v5273_v34 }
 0x3be   : > { %3224 = vmatpush.bf16.msra.mxu2 %v5281_v32  ;;  %3285 = vmatpush.bf16.msra.mxu3 %v5289_v35  ;;  %v5425_v32 = vld [vmem:[%s6822_s18 + $0x3] ss:$0 sm:$0xff] }
 0x3c1   : > { %3103 = vmatpush.bf16.msra.mxu0 %v5264_v39  ;;  %3164 = vmatpush.bf16.msra.mxu1 %v5272_v40 }
 0x3c2   : > { %3225 = vmatpush.bf16.msra.mxu2 %v5280_v38  ;;  %3286 = vmatpush.bf16.msra.mxu3 %v5288_v41 }
 0x3c4   : > { %3104 = vmatmul.bf16.vlgmr.msra.gmra.mxu0 %v1398_v21  ;;  %3165 = vmatmul.bf16.vlgmr.msra.gmra.mxu1 %v1398_v21 }
 0x3c5   : > { %3226 = vmatmul.bf16.vlgmr.msra.gmra.mxu2 %v1398_v21  ;;  %3287 = vmatmul.bf16.vlgmr.msra.gmra.mxu3 %v1398_v21 }
 0x420   : > { %v2585_v42 = vpop.f32.mrf.mxu0  ;;  %v2646_v43 = vpop.f32.mrf.mxu1 }
 0x421   : > { %v2586_v1 = vadd.f32 %v5414_v55, %v2585_v42  ;;  %v2647_v3 = vadd.f32 %v5415_v58, %v2646_v43 }
 0x423   : > { %v2772_v12 = vpack.c.bf16 %v2586_v1, %v2586_v1  ;;  %v2773_v13 = vpack.c.bf16 %v2647_v3, %v2647_v3 }
 0x427   : > { %v2707_v44 = vpop.f32.mrf.mxu2  ;;  %v2768_v45 = vpop.f32.mrf.mxu3 }
 0x428   : > { %v2587_v46 = vpop.f32.mrf.mxu0  ;;  %v2648_v47 = vpop.f32.mrf.mxu1  ;;  %v2708_v16 = vadd.f32 %v5416_v36, %v2707_v44  ;;  %v2769_v17 = vadd.f32 %v5417_v9, %v2768_v45 }
 0x42a   : > { %v2774_v20 = vpack.c.bf16 %v2708_v16, %v2708_v16  ;;  %v2775_v21 = vpack.c.bf16 %v2769_v17, %v2769_v17 }
 0x42f   : > { %v2709_v37 = vpop.f32.mrf.mxu2  ;;  %v2770_v50 = vpop.f32.mrf.mxu3 }
 0x430   : > { %v2845_v51 = vpop.f32.mrf.mxu0  ;;  %v2906_v52 = vpop.f32.mrf.mxu1  ;;  %v1400_v37 = vld [vmem:[%s896_s4] sm:$0xf]  ;;  %s6903_s4 = sld [smem:[#allocation32_spill]] }
 0x431   : > { %v2846_v53 = vadd.f32 %v5418_v48, %v2845_v51  ;;  %v2907_v54 = vadd.f32 %v5419_v49, %v2906_v52  ;;  %v3296_v52 = vunpack.c.l.bf16 %v1400_v37  ;;  %v5318_v37 = vld [vmem:[%s6825_s21 + $0x74] sm:$0xf] }
 0x433   : > { %v3032_v56 = vpack.c.bf16 %v2846_v53, %v2846_v53  ;;  %v3033_v57 = vpack.c.bf16 %v2907_v54, %v2907_v54 }
 0x435   : > { %v3301_v61 = vsel %vm2182_vm0, %v3032_v56, 0  ;;  %v3320_v62 = vsel %vm2182_vm0, %v3033_v57, 0 }
 0x436   : > { %3310 = vmatpush.bf16.xpose.msrb.mxu0 %v3301_v61  ;;  %3329 = vmatpush.bf16.xpose.msrb.mxu1 %v3320_v62  ;;  %s3929_s27 = scalar_lea.hbm %s6903_s4, %s5093_s24 }
 0x437   : > { %v2967_v63 = vpop.f32.mrf.mxu2  ;;  %v3028_v0 = vpop.f32.mrf.mxu3  ;;  %s3933_s13 = sshll.u32 %s3929_s27, 4  ;;  %s3934_s13 = int_to_ptr.hbm [resolvable:$true] %s3933_s13 }
 0x438   : > { %v2968_v5 = vadd.f32 %v5420_v59, %v2967_v63  ;;  %v3029_v6 = vadd.f32 %v5421_v60, %v3028_v0  ;;  %v2847_v7 = vpop.f32.mrf.mxu0  ;;  %v2908_v8 = vpop.f32.mrf.mxu1  ;;  %s5477_s2 = sshra.s32 %s3934_s13, 4  ;;  %s5478_s2 = int_to_ptr.hbm [resolvable:$true] %s5477_s2 }
 0x43a   : > { %v3034_v10 = vpack.c.bf16 %v2968_v5, %v2968_v5  ;;  %v3035_v11 = vpack.c.bf16 %v3029_v6, %v3029_v6 }
 0x43c   : > { %v3339_v14 = vsel %vm2182_vm0, %v3034_v10, 0  ;;  %v3358_v15 = vsel %vm2182_vm0, %v3035_v11, 0 }
 0x43d   : > { %3348 = vmatpush.bf16.xpose.msrb.mxu2 %v3339_v14  ;;  %3367 = vmatpush.bf16.xpose.msrb.mxu3 %v3358_v15 }
 0x43e   : > { %4920 = vmatmul.msk.bf16.vlgmr.msrb.gmra.mxu0 %vm2182_vm0, %v2772_v12  ;;  %4921 = vmatmul.msk.bf16.vlgmr.msrb.gmra.mxu1 %vm2182_vm0, %v2773_v13 }
 0x43f   : > { %v2969_v18 = vpop.f32.mrf.mxu2  ;;  %v3030_v19 = vpop.f32.mrf.mxu3 }
 0x441   : > { %v3105_v24 = vpop.f32.mrf.mxu0  ;;  %v3166_v25 = vpop.f32.mrf.mxu1 }
 0x442   : > { %v3106_v26 = vadd.f32 %v5422_v22, %v3105_v24  ;;  %v3167_v27 = vadd.f32 %v5423_v23, %v3166_v25  ;;  %v5301_v22 = vld [vmem:[%s6823_s19 + $0x28] sm:$0xff]  ;;  %v5303_v23 = vld [vmem:[%s6823_s19 + $0x38] sm:$0xff] }
 0x443   : > { %v5297_v24 = vld [vmem:[%s6823_s19 + $0x8] sm:$0xff]  ;;  %v5299_v25 = vld [vmem:[%s6823_s19 + $0x18] sm:$0xff] }
 0x444   : > { %4922 = vmatmul.msk.bf16.vlgmr.msrb.gmra.mxu2 %vm2182_vm0, %v2774_v20  ;;  %4923 = vmatmul.msk.bf16.vlgmr.msrb.gmra.mxu3 %vm2182_vm0, %v2775_v21  ;;  %v3292_v29 = vpack.c.bf16 %v3106_v26, %v3106_v26  ;;  %v3293_v30 = vpack.c.bf16 %v3167_v27, %v3167_v27 }
 0x446   : > { %v3425_v33 = vsel %vm2311_vm1, %v3292_v29, 0  ;;  %v3444_v34 = vsel %vm2311_vm1, %v3293_v30, 0 }
 0x447   : > { %3434 = vmatpush.bf16.msra.mxu0 %v3425_v33  ;;  %3453 = vmatpush.bf16.msra.mxu1 %v3444_v34 }
 0x448   : > { %v3227_v31 = vpop.f32.mrf.mxu2  ;;  %v3288_v39 = vpop.f32.mrf.mxu3 }
 0x449   : > { %v3228_v35 = vadd.f32 %v5424_v28, %v3227_v31  ;;  %v3107_v40 = vpop.f32.mrf.mxu0  ;;  %v3168_v41 = vpop.f32.mrf.mxu1  ;;  %v3289_v42 = vadd.f32 %v5425_v32, %v3288_v39 }
 0x44b   : > { %v3294_v38 = vpack.c.bf16 %v3228_v35, %v3228_v35  ;;  %v3295_v44 = vpack.c.bf16 %v3289_v42, %v3289_v42  ;;  %3522 = vmatpush.bf16.msrb.mxu0 %v5297_v24  ;;  %3550 = vmatpush.bf16.msrb.mxu1 %v5299_v25  ;;  %v4992_v24 = vld [vmem:[%s6825_s21 + $0x38] sm:$0xf0] }
 0x44d   : > { %v3463_v43 = vsel %vm2311_vm1, %v3294_v38, 0  ;;  %v3482_v45 = vsel %vm2311_vm1, %v3295_v44, 0  ;;  %v5300_v44 = vld [vmem:[%s6823_s19 + $0x20] sm:$0xff] }
 0x44e   : > { %3472 = vmatpush.bf16.msra.mxu2 %v3463_v43  ;;  %3491 = vmatpush.bf16.msra.mxu3 %v3482_v45  ;;  %v5302_v45 = vld [vmem:[%s6823_s19 + $0x30] sm:$0xff] }
 0x450   : > { %v3229_v46 = vpop.f32.mrf.mxu2  ;;  %v3290_v47 = vpop.f32.mrf.mxu3 }
 0x451   : > { %v5296_v46 = vld [vmem:[%s6823_s19] sm:$0xff]  ;;  %v5298_v47 = vld [vmem:[%s6823_s19 + $0x10] sm:$0xff] }
 0x452   : > { %3578 = vmatpush.bf16.msrb.mxu2 %v5301_v22  ;;  %3606 = vmatpush.bf16.msrb.mxu3 %v5303_v23  ;;  %v5310_v22 = vld [vmem:[%s6825_s21 + $0x34] sm:$0xf] }
 0x453   : > { %3523 = vmatpush.bf16.msrb.mxu0 %v5296_v46  ;;  %3551 = vmatpush.bf16.msrb.mxu1 %v5298_v47  ;;  %v4995_v25 = vor.u32 %v5310_v22, %v4992_v24  ;;  %v5327_v46 = vld [vmem:[%s6827_s23 + $0x38] sm:$0xff]  ;;  %v1360_v22 = vld [vmem:[%s6826_s22] sm:$0x3] }
 0x454   : > { %v5335_v47 = vld [vmem:[%s6827_s23 + $0x78] sm:$0xff]  ;;  %v3625_v24 = vperm.slane %v1360_v22, 1 }
 0x456   : > { %3579 = vmatpush.bf16.msrb.mxu2 %v5300_v44  ;;  %3607 = vmatpush.bf16.msrb.mxu3 %v5302_v45  ;;  %v4968_v44 = vld [vmem:[%s6825_s21 + $0x8] sm:$0xf0] }
 0x4bb   : > { %v3312_v48 = vpop.f32.mrf.mxu0  ;;  %v3331_v49 = vpop.f32.mrf.mxu1 }
 0x4bc   : > { %v3313_v59 = vadd.f32 %v3312_v48, %v3296_v52  ;;  %v3332_v60 = vadd.f32 %v3331_v49, %v3296_v52  ;;  %v5022_v48 = vld [vmem:[%s6825_s21 + $0x70] sm:$0xf]  ;;  %v5319_v49 = vld [vmem:[%s6825_s21 + $0x74] sm:$0xf0] }
 0x4be   : > { %v3373_v63 = vsel %vm2259_vm2, %v3313_v59, -inf  ;;  %v3376_v0 = vsel %vm2259_vm2, %v3332_v60, -inf }
 0x4c3   : > { %v3314_v50 = vpop.f32.mrf.mxu0  ;;  %v3333_v51 = vpop.f32.mrf.mxu1 }
 0x4c4   : > { %v5023_v50 = vor.u32 %v5319_v49, %v5022_v48  ;;  %v5024_v51 = vld [vmem:[%s6825_s21 + $0x78] sm:$0xf0]  ;;  %v5326_v48 = vld [vmem:[%s6827_s23 + $0x30] sm:$0xff] }
 0x4c5   : > { %v5334_v49 = vld [vmem:[%s6827_s23 + $0x70] sm:$0xff] }
 0x4c7   : > { %v3350_v53 = vpop.f32.mrf.mxu2  ;;  %v3369_v54 = vpop.f32.mrf.mxu3 }
 0x4c8   : > { %v3351_v55 = vadd.f32 %v3350_v53, %v3296_v52  ;;  %v3370_v56 = vadd.f32 %v3369_v54, %v3296_v52  ;;  %v5014_v52 = vld [vmem:[%s6825_s21 + $0x60] sm:$0xf]  ;;  %v5317_v53 = vld [vmem:[%s6825_s21 + $0x64] sm:$0xf0]  ;;  %v5027_v54 = vor.u32 %v5318_v37, %v5024_v51 }
 0x4c9   : > { %v5325_v37 = vld [vmem:[%s6827_s23 + $0x28] sm:$0xff]  ;;  %v5324_v51 = vld [vmem:[%s6827_s23 + $0x20] sm:$0xff] }
 0x4ca   : > { %v3382_v57 = vsel %vm2259_vm2, %v3370_v56, -inf  ;;  %v3379_v58 = vsel %vm2259_vm2, %v3351_v55, -inf }
 0x4cb   : > { %3383 = vmax.xlane.f32.xlu1 %v3382_v57  ;;  %3380 = vmax.xlane.f32.xlu0 %v3379_v58  ;;  %v5015_v57 = vor.u32 %v5317_v53, %v5014_v52  ;;  %v5332_v52 = vld [vmem:[%s6827_s23 + $0x60] sm:$0xff] }
 0x4cf   : > { %v3352_v61 = vpop.f32.mrf.mxu2  ;;  %v3371_v62 = vpop.f32.mrf.mxu3 }
 0x4d0   : > { %v5314_v61 = vld [vmem:[%s6825_s21 + $0x54] sm:$0xf]  ;;  %v5008_v62 = vld [vmem:[%s6825_s21 + $0x58] sm:$0xf0] }
 0x4d3   : > { %3374 = vmax.xlane.f32.xlu0 %v3373_v63  ;;  %3377 = vmax.xlane.f32.xlu1 %v3376_v0  ;;  %v5011_v0 = vor.u32 %v5314_v61, %v5008_v62 }
 0x53e   : > { %v3384_v1 = vpop.xlane.xlu1 %3383  ;;  %v3381_v3 = vpop.xlane.xlu0 %3380 }
 0x53f   : > { %v3388_v5 = vsub.f32 %v3370_v56, %v3384_v1  ;;  %v3387_v6 = vsub.f32 %v3351_v55, %v3381_v3  ;;  %v5316_v55 = vld [vmem:[%s6825_s21 + $0x64] sm:$0xf]  ;;  %v5016_v56 = vld [vmem:[%s6825_s21 + $0x68] sm:$0xf0]  ;;  %v4998_v1 = vld [vmem:[%s6825_s21 + $0x40] sm:$0xf] }
 0x540   : > { %v5019_v58 = vor.u32 %v5316_v55, %v5016_v56  ;;  %v5313_v3 = vld [vmem:[%s6825_s21 + $0x44] sm:$0xf0]  ;;  %v5331_v55 = vld [vmem:[%s6827_s23 + $0x58] sm:$0xff] }
 0x541   : > { %v3395_v7 = vmul.f32 1.442695, %v3388_v5  ;;  %v3393_v8 = vmul.f32 1.442695, %v3387_v6  ;;  %v5312_v5 = vld [vmem:[%s6825_s21 + $0x44] sm:$0xf] }
 0x542   : > { %v5000_v6 = vld [vmem:[%s6825_s21 + $0x48] sm:$0xf0] }
 0x543   : > { %5444 = vpow2.f32 %v3395_v7  ;;  %v4999_v7 = vor.u32 %v5313_v3, %v4998_v1 }
 0x544   : > { %5446 = vpow2.f32 %v3393_v8  ;;  %v5003_v8 = vor.u32 %v5312_v5, %v5000_v6 }
 0x546   : > { %v3375_v36 = vpop.xlane.xlu0 %3374  ;;  %v3378_v9 = vpop.xlane.xlu1 %3377 }
 0x547   : > { %v3385_v10 = vsub.f32 %v3313_v59, %v3375_v36  ;;  %v3386_v11 = vsub.f32 %v3332_v60, %v3378_v9  ;;  %v5006_v59 = vld [vmem:[%s6825_s21 + $0x50] sm:$0xf]  ;;  %v5315_v60 = vld [vmem:[%s6825_s21 + $0x54] sm:$0xf0] }
 0x548   : > { %v5007_v63 = vor.u32 %v5315_v60, %v5006_v59  ;;  %v5322_v59 = vld [vmem:[%s6827_s23 + $0x10] sm:$0xff] }
 0x549   : > { %v5445_v12 = vpop.eup %5444  ;;  %v3389_v13 = vmul.f32 1.442695, %v3385_v10  ;;  %v3391_v14 = vmul.f32 1.442695, %v3386_v11  ;;  %v5330_v60 = vld [vmem:[%s6827_s23 + $0x50] sm:$0xff] }
 0x54a   : > { %v5447_v15 = vpop.eup %5446  ;;  %v3406_v16 = vsel %vm2259_vm2, %v5445_v12, 0.0 }
 0x54b   : > { %5448 = vpow2.f32 %v3389_v13  ;;  %v3403_v17 = vsel %vm2259_vm2, %v5447_v15, 0.0  ;;  %3407 = vadd.xlane.f32.xlu1 %v3406_v16 }
 0x54c   : > { %5450 = vpow2.f32 %v3391_v14  ;;  %3404 = vadd.xlane.f32.xlu0 %v3403_v17 }
 0x551   : > { %v5449_v18 = vpop.eup %5448 }
 0x552   : > { %v5451_v19 = vpop.eup %5450  ;;  %v3397_v20 = vsel %vm2259_vm2, %v5449_v18, 0.0 }
 0x553   : > { %3398 = vadd.xlane.f32.xlu2 %v3397_v20  ;;  %v3400_v21 = vsel %vm2259_vm2, %v5451_v19, 0.0  ;;  %v4990_v20 = vld [vmem:[%s6825_s21 + $0x30] sm:$0xf] }
 0x554   : > { %3401 = vadd.xlane.f32.xlu0 %v3400_v21  ;;  %v5311_v21 = vld [vmem:[%s6825_s21 + $0x34] sm:$0xf0] }
 0x555   : > { %v4991_v23 = vor.u32 %v5311_v21, %v4990_v20 }
 0x5be   : > { %v3408_v26 = vpop.xlane.xlu1 %3407 }
 0x5bf   : > { %v3405_v27 = vpop.xlane.xlu0 %3404  ;;  %5452 = vrcp.f32 %v3408_v26  ;;  %v4982_v26 = vld [vmem:[%s6825_s21 + $0x20] sm:$0xf] }
 0x5c0   : > { %5454 = vrcp.f32 %v3405_v27  ;;  %v5309_v27 = vld [vmem:[%s6825_s21 + $0x24] sm:$0xf0] }
 0x5c5   : > { %v5453_v28 = vpop.eup %5452 }
 0x5c6   : > { %v5455_v29 = vpop.eup %5454  ;;  %v3416_v30 = vmul.f32 %v5453_v28, %v5445_v12  ;;  %v3399_v31 = vpop.xlane.xlu2 %3398  ;;  %v5308_v28 = vld [vmem:[%s6825_s21 + $0x24] sm:$0xf] }
 0x5c7   : > { %v3415_v32 = vmul.f32 %v5455_v29, %v5447_v15  ;;  %5456 = vrcp.f32 %v3399_v31  ;;  %v3402_v33 = vpop.xlane.xlu0 %3401  ;;  %v4983_v29 = vor.u32 %v5309_v27, %v4982_v26 }
 0x5c8   : > { %v3420_v34 = vpack.c.bf16 %v3416_v30, %v3416_v30  ;;  %5458 = vrcp.f32 %v3402_v33  ;;  %v4984_v30 = vld [vmem:[%s6825_s21 + $0x28] sm:$0xf0]  ;;  %v5307_v33 = vld [vmem:[%s6825_s21 + $0x14] sm:$0xf0] }
 0x5c9   : > { %v3419_v35 = vpack.c.bf16 %v3415_v32, %v3415_v32  ;;  %v4987_v31 = vor.u32 %v5308_v28, %v4984_v30  ;;  %v4974_v32 = vld [vmem:[%s6825_s21 + $0x10] sm:$0xf] }
 0x5ca   : > { %4927 = vmatmul.msk.bf16.vlgmr.msra.gmra.mxu3 %vm2259_vm2, %v3420_v34  ;;  %v4975_v34 = vor.u32 %v5307_v33, %v4974_v32 }
 0x5cb   : > { %4926 = vmatmul.msk.bf16.vlgmr.msra.gmra.mxu2 %vm2259_vm2, %v3419_v35  ;;  %v5306_v35 = vld [vmem:[%s6825_s21 + $0x14] sm:$0xf]  ;;  %3850 = vmatpush.bf16.msra.mxu3 %v5335_v47 }
 0x5cc   : > { %3837 = vmatpush.bf16.msra.mxu2 %v5327_v46 }
 0x5cd   : > { %v5457_v38 = vpop.eup %5456 }
 0x5ce   : > { %v5459_v39 = vpop.eup %5458  ;;  %v3413_v40 = vmul.f32 %v5457_v38, %v5449_v18  ;;  %v4976_v38 = vld [vmem:[%s6825_s21 + $0x18] sm:$0xf0] }
 0x5cf   : > { %v3414_v41 = vmul.f32 %v5459_v39, %v5451_v19  ;;  %v4979_v39 = vor.u32 %v5306_v35, %v4976_v38  ;;  %3851 = vmatpush.bf16.msra.mxu3 %v5334_v49  ;;  %v5576_v35 = vmov 0.0   ;;  %v5427_v38 = vld [vmem:[%s6902_s8] ss:$0 sm:$0xff]  ;;  %s5479_s8 = scalar_lea.hbm %s5478_s2, 8 }
 0x5d0   : > { %v3417_v42 = vpack.c.bf16 %v3413_v40, %v3413_v40  ;;  %v4966_v40 = vld [vmem:[%s6825_s21] sm:$0xf]  ;;  %3838 = vmatpush.bf16.msra.mxu2 %v5326_v48  ;;  %3870 = vst [vmem:[%s6738_s0] sm:$0x1] %v5576_v35  ;;  %p5480_p12 = scmp.ne.s32.totalorder %s5478_s2, %s5479_s8 }
 0x5d1   : > { %v3418_v43 = vpack.c.bf16 %v3414_v41, %v3414_v41  ;;  %v5305_v41 = vld [vmem:[%s6825_s21 + $0x4] sm:$0xf0] }
 0x5d2   : > { %4924 = vmatmul.msk.bf16.vlgmr.msra.gmra.mxu0 %vm2259_vm2, %v3417_v42  ;;  %v5304_v42 = vld [vmem:[%s6825_s21 + $0x4] sm:$0xf]  ;;  %p5481_p13 = pnand %p5480_p12, %p5752_p4 }
 0x5d3   : > { %4925 = vmatmul.msk.bf16.vlgmr.msra.gmra.mxu1 %vm2259_vm2, %v3418_v43  ;;  %3708 = vmatpush.bf16.msra.mxu0 %v5023_v50  ;;  %v4967_v43 = vor.u32 %v5305_v41, %v4966_v40  ;;  %v4971_v45 = vor.u32 %v5304_v42, %v4968_v44  ;;  %v5333_v50 = vld [vmem:[%s6827_s23 + $0x68] sm:$0xff] }
 0x5d4   : > { %3721 = vmatpush.bf16.msra.mxu1 %v5027_v54  ;;  %3839 = vmatpush.bf16.msra.mxu2 %v5325_v37  ;;  %v5323_v54 = vld [vmem:[%s6827_s23 + $0x18] sm:$0xff]  ;;  %p5482_p0 = pneg %p5481_p13 }
 0x5d5   : > { %3852 = vmatpush.bf16.msra.mxu3 %v5333_v50 }
 0x5d7   : > { %3709 = vmatpush.bf16.msra.mxu0 %v5015_v57 }
 0x5d8   : > { %3722 = vmatpush.bf16.msra.mxu1 %v5019_v58  ;;  %3840 = vmatpush.bf16.msra.mxu2 %v5324_v51 }
 0x5d9   : > { %3853 = vmatpush.bf16.msra.mxu3 %v5332_v52 }
 0x5db   : > { %3710 = vmatpush.bf16.msra.mxu0 %v5007_v63  ;;  %v5426_v63 = vld [vmem:[%s6824_s20] ss:$0 sm:$0xff] }
 0x5dc   : > { %3723 = vmatpush.bf16.msra.mxu1 %v5011_v0  ;;  %3841 = vmatpush.bf16.msra.mxu2 %v5323_v54 }
 0x5dd   : > { %3854 = vmatpush.bf16.msra.mxu3 %v5331_v55 }
 0x5df   : > { %3711 = vmatpush.bf16.msra.mxu0 %v4999_v7 }
 0x5e0   : > { %3724 = vmatpush.bf16.msra.mxu1 %v5003_v8  ;;  %3842 = vmatpush.bf16.msra.mxu2 %v5322_v59 }
 0x5e1   : > { %3855 = vmatpush.bf16.msra.mxu3 %v5330_v60 }
 0x5e3   : > { %3712 = vmatpush.bf16.msra.mxu0 %v4991_v23  ;;  %v3624_v23 = vperm.slane %v1360_v22, 0 }
 0x5e4   : > { %3725 = vmatpush.bf16.msra.mxu1 %v4995_v25 }
 0x5e7   : > { %3713 = vmatpush.bf16.msra.mxu0 %v4983_v29 }
 0x5e8   : > { %3726 = vmatpush.bf16.msra.mxu1 %v4987_v31 }
 0x5eb   : > { %3714 = vmatpush.bf16.msra.mxu0 %v4975_v34 }
 0x5ec   : > { %3727 = vmatpush.bf16.msra.mxu1 %v4979_v39 }
 0x5ef   : > { %3715 = vmatpush.bf16.msra.mxu0 %v4967_v43 }
 0x5f0   : > { %3728 = vmatpush.bf16.msra.mxu1 %v4971_v45 }
 0x64d   : > { %v3493_v36 = vpop.f32.mrf.mxu3 }
 0x64e   : > { %v3474_v9 = vpop.f32.mrf.mxu2  ;;  %v3500_v10 = vpack.c.bf16 %v3493_v36, %v3493_v36 }
 0x64f   : > { %v3499_v11 = vpack.c.bf16 %v3474_v9, %v3474_v9  ;;  %v3436_v12 = vpop.f32.mrf.mxu0 }
 0x650   : > { %v3497_v13 = vpack.c.bf16 %v3436_v12, %v3436_v12  ;;  %v3455_v14 = vpop.f32.mrf.mxu1  ;;  %4963 = vmatmul.msk.bf16.vlgmr.msrb.gmra.mxu3 %vm2182_vm0, %v3500_v10  ;;  %v5462_v10 = vld [vmem:[%s6178_s1] sm:$0xff]  ;;  %s6904_s1 = smov %s6903_s4 }
 0x651   : > { %v3498_v15 = vpack.c.bf16 %v3455_v14, %v3455_v14  ;;  %4954 = vmatmul.msk.bf16.vlgmr.msrb.gmra.mxu2 %vm2182_vm0, %v3499_v11  ;;  %v3885_v11 = vsel %vm3884_vm3, %v5462_v10, 0.0  ;;  %v5321_v14 = vld [vmem:[%s6827_s23 + $0x8] sm:$0xff]  ;;  %s5483_s11 = scalar_lea.hbm %s6904_s1, 16  ;;  %p5484_p1 = scmp.lt.s32.totalorder %s5478_s2, %s6904_s1 }
 0x652   : > { %4936 = vmatmul.msk.bf16.vlgmr.msrb.gmra.mxu0 %vm2182_vm0, %v3497_v13  ;;  %v3886_v12 = vrot.slane %v3885_v11, 4  ;;  %3843 = vmatpush.bf16.msra.mxu2 %v5321_v14  ;;  %p5485_p2 = scmp.lt.s32.totalorder %s5483_s11, %s5479_s8 }
 0x653   : > { %4945 = vmatmul.msk.bf16.vlgmr.msrb.gmra.mxu1 %vm2182_vm0, %v3498_v15  ;;  %v5329_v15 = vld [vmem:[%s6827_s23 + $0x48] sm:$0xff] }
 0x654   : > { %v3887_v13 = vadd.f32 %v3886_v12, %v3885_v11  ;;  %3856 = vmatpush.bf16.msra.mxu3 %v5329_v15  ;;  %p5486_p3 = por %p5485_p2, %p5484_p1 }
 0x655   : > { %v3495_v16 = vpop.f32.mrf.mxu3 }
 0x656   : > { %v3476_v17 = vpop.f32.mrf.mxu2  ;;  %v3888_v16 = vrot.slane %v3887_v13, 2  ;;  %p5487_p5 = pnand %p5486_p3, %p5482_p0 }
 0x657   : > { %v3438_v18 = vpop.f32.mrf.mxu0  ;;  %v5320_v17 = vld [vmem:[%s6827_s23] sm:$0xff] }
 0x658   : > { %v3457_v19 = vpop.f32.mrf.mxu1  ;;  %v5328_v18 = vld [vmem:[%s6827_s23 + $0x40] sm:$0xff]  ;;  %3844 = vmatpush.bf16.msra.mxu2 %v5320_v17 }
 0x659   : > { %v3889_v19 = vadd.f32 %v3888_v16, %v3887_v13  ;;  %3857 = vmatpush.bf16.msra.mxu3 %v5328_v18 }
 0x65b   : > { %v3890_v20 = vrot.slane %v3889_v19, 1 }
 0x65d   : > { %v3891_v21 = vadd.f32 %v3890_v20, %v3889_v19 }
 0x65f   : > { %3894 = vperm.xlu1 %5399, %v3891_v21  }
 0x6cf   : > { %v3525_v53 = vpop.f32.mrf.mxu0 }
 0x6d0   : > { %v3553_v56 = vpop.f32.mrf.mxu1 }
 0x6d1   : > { %v3613_v57 = vadd.f32 %v3553_v56, %v3525_v53  ;;  %v3895_v39 = vpop.permute.xlu1 %3894 }
 0x6d2   : > { %5460 = vrcp.f32 %v3895_v39 }
 0x6d3   : > { %v3609_v58 = vpop.f32.mrf.mxu3 }
 0x6d4   : > { %v3581_v61 = vpop.f32.mrf.mxu2 }
 0x6d5   : > { %v3614_v62 = vadd.f32 %v3613_v57, %v3581_v61 }
 0x6d7   : > { %v3615_v0 = vadd.f32 %v3614_v62, %v3609_v58  ;;  %v3527_v1 = vpop.f32.mrf.mxu0 }
 0x6d8   : > { %v3555_v3 = vpop.f32.mrf.mxu1  ;;  %v5461_v46 = vpop.eup %5460 }
 0x6d9   : > { %v3619_v5 = vadd.f32 %v5426_v63, %v3615_v0 }
 0x6db   : > { %v3620_v6 = vadd.f32 %v3619_v5, %v6384_v4  ;;  %v3611_v7 = vpop.f32.mrf.mxu3 }
 0x6dc   : > { %v3583_v8 = vpop.f32.mrf.mxu2 }
 0x6dd   : > { %v3621_v36 = vmul.f32 %v3620_v6, %v6380_v2 }
 0x6df   : > { %v3622_v9 = vpack.c.bf16 %v3621_v36, %v3621_v36 }
 0x6e1   : > { %3716 = vmatmul.bf16.vlgmr.msra.gmra.mxu0 %v3622_v9  ;;  %3729 = vmatmul.bf16.vlgmr.msra.gmra.mxu1 %v3622_v9 }
 0x75e   : > { %v3717_v25 = vpop.f32.mrf.mxu0  ;;  %v3730_v26 = vpop.f32.mrf.mxu1 }
 0x75f   : > { %v3718_v27 = vadd.f32 %v3717_v25, %v3624_v23  ;;  %v3731_v28 = vadd.f32 %v3730_v26, %v3625_v24 }
 0x761   : > { %v3734_v29 = vmax.f32 %v3718_v27, 0.0  ;;  %v3735_v30 = vmax.f32 %v3731_v28, 0.0 }
 0x763   : > { %v3736_v31 = vpack.c.bf16 %v3734_v29, %v3734_v29  ;;  %v3737_v32 = vpack.c.bf16 %v3735_v30, %v3735_v30 }
 0x765   : > { %3845 = vmatmul.bf16.vlgmr.msra.gmra.mxu2 %v3736_v31  ;;  %3858 = vmatmul.bf16.vlgmr.msra.gmra.mxu3 %v3737_v32 }
 0x766   : > { %v3719_v33 = vpop.f32.mrf.mxu0  ;;  %v3732_v34 = vpop.f32.mrf.mxu1 }
 0x7e8   : > { %v3846_v40 = vpop.f32.mrf.mxu2  ;;  %v3859_v41 = vpop.f32.mrf.mxu3 }
 0x7e9   : > { %v3847_v42 = vadd.f32 %v5427_v38, %v3846_v40 }
 0x7eb   : > { %v3860_v43 = vadd.f32 %v3859_v41, %v3847_v42 }
 0x7ed   : > { %v3863_v44 = vadd.f32 %v3860_v43, %v6384_v4 }
 0x7ef   : > { %v3864_v45 = vmul.f32 %v3863_v44, %v6380_v2 }
 0x7f0   : > { %v3848_v47 = vpop.f32.mrf.mxu2  ;;  %v3861_v48 = vpop.f32.mrf.mxu3 }
 0x7f1   : > { %v3872_v49 = vrot.slane %v3864_v45, 4  ;;  %3865 = vst [vmem:[%s868_s9] sm:$0xff] %v3864_v45 }
 0x7f2   : > { %5490 = shalt.err (!%p5487_p5)
}
 0x7f3   : > { %5336 = dma.vmem_to_hbm [thread:$0]  (%p5752_p4), %s3932_s7, 128, %s3934_s13, %s3914_s5   ;;  %v3873_v2 = vadd.f32 %v3872_v49, %v3864_v45  ;;  %v3898_v4 = vmul.f32 %v5461_v46, %v3895_v39  ;;  %v3871_v53 = vld [vmem:[%s6738_s0] sm:$0x1]  ;;  %vm3902_vm4 = vweird.f32 %v3895_v39  ;;  %vm3903_vm5 = vweird.f32 %v5461_v46 }
 0x7f4   : > { %v3908_v57 = vand.u32 2147483648, %v3895_v39  ;;  %v3906_v59 = vand.u32 2147483647, %v3895_v39  ;;  %vm3904_vm6 = vmor %vm3902_vm4, %vm3903_vm5  ;;  %s6906_s9 = sld [smem:[#allocation33_spill]]  ;;  %s3944_s5 = sshll.u32 %s6738_s0, 4  ;;  %s3945_s5 = int_to_ptr.vmem [resolvable:$true] %s3944_s5 }
 0x7f5   : > { %v3874_v37 = vrot.slane %v3873_v2, 2  ;;  %v3899_v51 = vsub.f32 1.0, %v3898_v4  ;;  %s3919_s8 = scalar_lea.sflag [#allocation5], %s6735_s28 }
 0x7f6   : > { %v3909_v60 = vor.u32 1.1754944e-38, %v3908_v57  ;;  %vm3907_vm7 = vcmp.eq.f32.partialorder %v3906_v59, 8.507059e+37 }
 0x7f7   : > { %v3875_v50 = vadd.f32 %v3874_v37, %v3873_v2  ;;  %v3900_v55 = vmul.f32 %v5461_v46, %v3899_v51 }
 0x7f9   : > { %v3876_v52 = vrot.slane %v3875_v50, 1  ;;  %v3901_v58 = vadd.f32 %v5461_v46, %v3900_v55 }
 0x7fa   : > { %s3942_s7 = scalar_lea.hbm %s6906_s9, %s6901_s6  ;;  %s5511_s10 = scalar_lea.hbm %s6906_s9, 2 }
 0x7fb   : > { %v3877_v54 = vadd.f32 %v3876_v52, %v3875_v50  ;;  %v3905_v61 = vsel %vm3904_vm6, %v5461_v46, %v3901_v58  ;;  %s3946_s2 = sshll.u32 %s3942_s7, 4  ;;  %s3947_s2 = int_to_ptr.hbm [resolvable:$true] %s3946_s2 }
 0x7fc   : > { %v3910_v62 = vsel %vm3907_vm7, %v3909_v60, %v3905_v61  ;;  %s5505_s24 = sshra.s32 %s3947_s2, 4  ;;  %s5506_s24 = int_to_ptr.hbm [resolvable:$true] %s5505_s24 }
 0x7fd   : > { %v3878_v56 = vadd.f32 %v3877_v54, %v3871_v53  ;;  %s5507_s30 = scalar_lea.hbm %s5506_s24, 1  ;;  %p5512_p10 = scmp.lt.s32.totalorder %s5506_s24, %s6906_s9 }
 0x7fe   : > { %p5508_p6 = scmp.ne.s32.totalorder %s5506_s24, %s5507_s30  ;;  %p5513_p11 = scmp.lt.s32.totalorder %s5511_s10, %s5507_s30 }
 0x7ff   : > { %3879 = vst [vmem:[%s6738_s0] sm:$0x1] %v3878_v56 }
 0x800   : > { %p5509_p7 = pnand %p5508_p6, %p5752_p4  ;;  %p5514_p12 = por %p5513_p11, %p5512_p10 }
 0x802   : > { %p5510_p9 = pneg %p5509_p7 }
 0x804   : > { %p5515_p13 = pnand %p5514_p12, %p5510_p9 }
 0x806   : > { %v3883_v63 = vld [vmem:[%s6738_s0] sm:$0x1] }
 0x807   : > { %v3911_v0 = vmul.f32 %v3910_v62, %v3883_v63 }
 0x809   : > { %3912 = vst [vmem:[%s6738_s0] sm:$0x1] %v3911_v0 }
 0x80a   : > { %5518 = shalt.err (!%p5515_p13)
}
 0x80b   : > { %5337 = dma.vmem_to_hbm [thread:$0]  (%p5752_p4), %s3945_s5, 16, %s3947_s2, %s3919_s8  }
 0x80c PF: > { %s6907_s28 = sld [smem:[#allocation12_spill]] }
 0x80d   : > { %s6908_s0 = sld [smem:[#allocation8_spill]] }
 0x812   : > { %p5347_p0 = scmp.ge.s32.totalorder %s6907_s28, 2 }
 0x813   : > { %s3958_s7 = sand.u32 1, %s6908_s0  }
 0x814   : > { %p5341_p1 = pnand %p5347_p0, %p5759_p8  ;;  %s3959_s6 = scalar_lea.sflag [#allocation3], %s3958_s7 }
 0x816   : > { %p5342_p2 = pneg %p5341_p1 }
 0x818   : > { %5544 = dma.done.wait (%p5342_p2), %s3959_s6, 128  }
 0x819   : > { %5546 = vsyncadd (%p5342_p2), %s3959_s6, 4294967168  ;;  %s3969_s24 = scalar_lea.sflag [#allocation5], %s3958_s7 }
 0x81a   : > { %5548 = dma.done.wait (%p5342_p2), %s3969_s24, 16  }
 0x81b   : > { %5550 = vsyncadd (%p5342_p2), %s3969_s24, 4294967280  ;;  %s43_s4 = sadd.s32 1, %s6907_s28   ;;  %s6910_s12 = sld [smem:[#allocation9_spill]] }
 0x81c   : > { %p40_p3 = scmp.ge.s32.totalorder %s43_s4, 4   ;;  %s6911_s7 = sld [smem:[#allocation16_spill]] }
 0x81d   : > { %s6912_s28 = sld [smem:[#allocation11_spill]]  ;;  %s6914_s27 = smov %s5557_s3 }
 0x81e   : > { %s6913_s8 = sld [smem:[#allocation13_spill]]  ;;  %42 = sbr.rel (!%p40_p3) target bundleno = 24 (0x18), region = 192 }
 0x821   : > { %s6915_s3 = smov %s6910_s12 }
 0x823   :  { %3974 = vsyncpa [#allocation3], 1 }
 0x824   :  { %3976 = vsyncpa [#allocation3 + $0x1], 1 }
 0x825   :  { %3977 = vsyncpa [#allocation5], 1 }
 0x826   :  { %3979 = vsyncpa [#allocation5 + $0x1], 1 }

</bundles_post_ra>
